<compile_context>
chip_gen: v7x
topology: tpu7x:2x2x1
jax: 0.10.0
libtpu: 0.0.40
codegen_flags: <defaults>
</compile_context>

<pallas_src>
import functools
import math

import jax
import jax.numpy as jnp
from jax.experimental import pallas as pl
from jax.experimental.pallas import tpu as pltpu
from jax.scipy.linalg import block_diag


def _coord_attn_kernel(H, x_ref, pool_ref, eh_ref, ew_ref,
                       wr_ref, br_ref, wh_ref, bh_ref, ww_ref, bw_ref,
                       o_ref):
    HI = jax.lax.Precision.HIGHEST

    # x_ref / o_ref: (TB*C, H*W) lane-dense slab (native dtype).
    x = x_ref[...]

    # Directional average pooling as one MXU matmul (f32 accumulate):
    #   pools[:, :H] -> mean over W (the "h" branch)
    #   pools[:, H:] -> mean over H (the "w" branch)
    pools = jnp.dot(x, pool_ref[...], precision=HI,
                    preferred_element_type=jnp.float32)              # (TB*C, H+W)

    # Channel squeeze: block-diagonal 1x1 conv (BN folded) + bias + ReLU.
    y = jnp.dot(wr_ref[...], pools, precision=HI,
                preferred_element_type=jnp.float32) + br_ref[...]
    y = jnp.maximum(y, 0.0)                                          # (TB*Cr, H+W)

    # Channel excitation: block-diagonal 1x1 convs + sigmoid gates.
    gh = jax.nn.sigmoid(
        jnp.dot(wh_ref[...], y[:, :H], precision=HI,
                preferred_element_type=jnp.float32) + bh_ref[...])   # (TB*C, H)
    gw = jax.nn.sigmoid(
        jnp.dot(ww_ref[...], y[:, H:], precision=HI,
                preferred_element_type=jnp.float32) + bw_ref[...])   # (TB*C, W)

    # Expand gates to the flat H*W lane layout with 0/1 selection matmuls,
    # multiplying them in sequentially to lower peak live temporaries:
    #   gh_flat[r, l] = gh[r, l // W],   gw_flat[r, l] = gw[r, l % W]
    gh_flat = jnp.dot(gh, eh_ref[...], precision=HI,
                      preferred_element_type=jnp.float32)            # (TB*C, HW)
    out = x.astype(jnp.float32) * gh_flat
    gw_flat = jnp.dot(gw, ew_ref[...], precision=HI,
                      preferred_element_type=jnp.float32)            # (TB*C, HW)
    o_ref[...] = (out * gw_flat).astype(o_ref.dtype)


def coord_attn(x, w_reduce, bn_gamma, bn_beta, bn_mean, bn_var,
               w_h, b_h, w_w, b_w, eps=1e-5,
               block_batch=None, vmem_limit_bytes=64 * 1024 * 1024):
    """x: (B, C, H, W). Returns (B, C, H, W)."""
    B, C, H, W = x.shape
    Cr = w_reduce.shape[0]
    HW = H * W
    itemsize = jnp.dtype(x.dtype).itemsize

    # ---- fold eval-mode BatchNorm into the reduce conv ----
    scale = bn_gamma / jnp.sqrt(bn_var + eps)                        # (Cr,)
    wr_folded = (w_reduce * scale[:, None]).astype(jnp.float32)      # (Cr, C)
    br_col = (bn_beta - bn_mean * scale)[:, None]                    # (Cr, 1)

    # ---- constant pooling / expansion matrices (resident in VMEM) ----
    # Pooling matrix pairs with x on the MXU: use bf16 operands for bf16 inputs
    # (single-pass MXU path), f32 otherwise. Expansion matrices pair with the
    # f32 gates, so they stay f32.
    pool_dtype = jnp.bfloat16 if x.dtype == jnp.bfloat16 else jnp.float32
    l = jnp.arange(HW)
    h_idx = l // W
    w_idx = l % W
    p_h = (h_idx[:, None] == jnp.arange(H)[None, :]).astype(jnp.float32) / float(W)
    p_w = (w_idx[:, None] == jnp.arange(W)[None, :]).astype(jnp.float32) / float(H)
    pool_mat = jnp.concatenate([p_h, p_w], axis=1).astype(pool_dtype)        # (HW, H+W)
    e_h = (jnp.arange(H)[:, None] == h_idx[None, :]).astype(jnp.float32)     # (H, HW)
    e_w = (jnp.arange(W)[:, None] == w_idx[None, :]).astype(jnp.float32)     # (W, HW)

    # ---- batch-tile heuristic (honest VMEM accounting) ----
    sub = 8 // math.gcd(C, 8)            # smallest tb step s.t. tb*C is sublane-aligned

    def vmem_estimate(t):
        blk = t * C * HW                                   # elements in one x block
        bd = t * Cr * t * C                                # one block-diag weight
        consts = (HW * (H + W) + (H + W) * HW              # pooling + expansion mats
                  + 3 * bd                                  # wr_bd, wh_bd, ww_bd
                  + t * Cr * (H + W) + t * C * (H + W))     # bias slabs
        # 2x in + 2x out (double-buffered) + ~3 full-size f32 temps + constants(x2)
        return 4 * blk * itemsize + 3 * blk * 4 + 2 * consts * 4

    if block_batch is None:
        budget = int(0.6 * vmem_limit_bytes)               # headroom for spill/regalloc
        # ~2 MiB x blocks: >=85% of HBM roofline on v5e/v6e, inside v7x 1-4 MiB window.
        tb = max(1, (2 * 1024 * 1024) // (C * HW * itemsize))
        tb = min(B, tb)
        tb = max(sub, (tb // sub) * sub)                    # sublane alignment
        while tb > sub and vmem_estimate(tb) > budget:      # fit scoped VMEM
            tb -= sub
        while tb > sub and pl.cdiv(B, tb) < 2:              # keep both v7x TCs busy
            tb -= sub
    else:
        tb = int(block_batch)

    grid_len = int(pl.cdiv(B, tb))
    # Best effort: even grid length for balanced megacore sharding on v7x.
    if grid_len > 2 and grid_len % 2 == 1:
        tb2 = max(sub, ((int(pl.cdiv(B, grid_len + 1)) + sub - 1) // sub) * sub)
        if int(pl.cdiv(B, tb2)) % 2 == 0:
            tb = tb2
            grid_len = int(pl.cdiv(B, tb))
    B_pad = grid_len * tb

    # ---- block-diagonal weights + tiled lane-dense biases (resident constants) ----
    wr_bd = block_diag(*([wr_folded] * tb)).astype(jnp.float32)              # (tb*Cr, tb*C)
    wh_bd = block_diag(*([w_h.astype(jnp.float32)] * tb))                    # (tb*C, tb*Cr)
    ww_bd = block_diag(*([w_w.astype(jnp.float32)] * tb))                    # (tb*C, tb*Cr)
    br_t = jnp.tile(jnp.broadcast_to(br_col, (Cr, H + W)), (tb, 1)).astype(jnp.float32)
    bh_t = jnp.tile(jnp.broadcast_to(b_h[:, None], (C, H)), (tb, 1)).astype(jnp.float32)
    bw_t = jnp.tile(jnp.broadcast_to(b_w[:, None], (C, W)), (tb, 1)).astype(jnp.float32)

    # ---- lane-dense slab + ragged-batch padding ----
    x_flat = x.reshape(B * C, HW)
    if B_pad != B:
        x_flat = jnp.pad(x_flat, ((0, (B_pad - B) * C), (0, 0)))

    out_flat = pl.pallas_call(
        functools.partial(_coord_attn_kernel, H),
        out_shape=jax.ShapeDtypeStruct((B_pad * C, HW), x.dtype),
        grid=(grid_len,),
        in_specs=[
            pl.BlockSpec((tb * C, HW), lambda i: (i, 0)),        # x (lane-dense)
            pl.BlockSpec((HW, H + W), lambda i: (0, 0)),         # pooling matrix
            pl.BlockSpec((H, HW), lambda i: (0, 0)),             # expand-h matrix
            pl.BlockSpec((W, HW), lambda i: (0, 0)),             # expand-w matrix
            pl.BlockSpec((tb * Cr, tb * C), lambda i: (0, 0)),   # block-diag reduce (BN folded)
            pl.BlockSpec((tb * Cr, H + W), lambda i: (0, 0)),    # folded BN bias slab
            pl.BlockSpec((tb * C, tb * Cr), lambda i: (0, 0)),   # block-diag span_h
            pl.BlockSpec((tb * C, H), lambda i: (0, 0)),         # span_h bias slab
            pl.BlockSpec((tb * C, tb * Cr), lambda i: (0, 0)),   # block-diag span_w
            pl.BlockSpec((tb * C, W), lambda i: (0, 0)),         # span_w bias slab
        ],
        out_specs=pl.BlockSpec((tb * C, HW), lambda i: (i, 0)),
        compiler_params=pltpu.CompilerParams(
            dimension_semantics=("parallel",),
            vmem_limit_bytes=vmem_limit_bytes),
    )(x_flat, pool_mat, e_h, e_w, wr_bd, br_t, wh_bd, bh_t, ww_bd, bw_t)

    return out_flat[:B * C].reshape(B, C, H, W)


def coord_attn_ref(x, w_reduce, bn_gamma, bn_beta, bn_mean, bn_var,
                   w_h, b_h, w_w, b_w, eps=1e-5):
    """Pure-JAX reference mirroring the PyTorch forward (eval-mode BN)."""
    HI = jax.lax.Precision.HIGHEST
    B, C, H, W = x.shape
    x_h_pool = x.mean(axis=3)                                        # (B, C, H)
    x_w_pool = x.mean(axis=2)                                        # (B, C, W)
    cat = jnp.concatenate([x_h_pool, x_w_pool], axis=-1)             # (B, C, H+W)
    red = jnp.einsum('rc,bcs->brs', w_reduce, cat, precision=HI)     # (B, Cr, H+W)
    scale = bn_gamma / jnp.sqrt(bn_var + eps)
    red = red * scale[None, :, None] + (bn_beta - bn_mean * scale)[None, :, None]
    red = jnp.maximum(red, 0.0)
    y_h, y_w = red[..., :H], red[..., H:]
    wh = jax.nn.sigmoid(jnp.einsum('cr,brs->bcs', w_h, y_h, precision=HI)
                        + b_h[None, :, None])
    ww = jax.nn.sigmoid(jnp.einsum('cr,brs->bcs', w_w, y_w, precision=HI)
                        + b_w[None, :, None])
    return x * wh[:, :, :, None] * ww[:, :, None, :]


if __name__ == "__main__":
    B, C, H, W = 2, 32, 16, 16
    reduction = 8
    Cr = C // reduction

    key = jax.random.PRNGKey(0)
    ks = jax.random.split(key, 10)

    x = jax.random.normal(ks[0], (B, C, H, W), dtype=jnp.float32)

    # Conv2d(c, c//r, 1, bias=False) weight -> (Cr, C)
    w_reduce = jax.random.normal(ks[1], (Cr, C), dtype=jnp.float32) * 0.2
    # BatchNorm2d(Cr) parameters / running stats (eval-mode)
    bn_gamma = 1.0 + 0.1 * jax.random.normal(ks[2], (Cr,), dtype=jnp.float32)
    bn_beta = 0.1 * jax.random.normal(ks[3], (Cr,), dtype=jnp.float32)
    bn_mean = 0.05 * jax.random.normal(ks[4], (Cr,), dtype=jnp.float32)
    bn_var = 1.0 + 0.1 * jnp.abs(jax.random.normal(ks[5], (Cr,), dtype=jnp.float32))
    # Conv2d(Cr, C, 1) weights/biases -> (C, Cr), (C,)
    w_h = jax.random.normal(ks[6], (C, Cr), dtype=jnp.float32) * 0.2
    b_h = 0.1 * jax.random.normal(ks[7], (C,), dtype=jnp.float32)
    w_w = jax.random.normal(ks[8], (C, Cr), dtype=jnp.float32) * 0.2
    b_w = 0.1 * jax.random.normal(ks[9], (C,), dtype=jnp.float32)

    out = coord_attn(x, w_reduce, bn_gamma, bn_beta, bn_mean, bn_var,
                     w_h, b_h, w_w, b_w)
    out = jax.block_until_ready(out)

    ref = coord_attn_ref(x, w_reduce, bn_gamma, bn_beta, bn_mean, bn_var,
                         w_h, b_h, w_w, b_w)

    assert out.shape == (B, C, H, W)
    assert jnp.allclose(out, ref, atol=2e-5, rtol=2e-5), "mismatch vs JAX reference"
    print("KERNEL_OK")
</pallas_src>

<mosaic_0001>
module attributes {stable_mosaic.version = 11 : i64} {
  func.func @_coord_attn_kernel(%arg0: i32, %arg1: memref<32x256xf32, #tpu.memory_space<vmem>>, %arg2: memref<256x32xf32, #tpu.memory_space<vmem>>, %arg3: memref<16x256xf32, #tpu.memory_space<vmem>>, %arg4: memref<16x256xf32, #tpu.memory_space<vmem>>, %arg5: memref<4x32xf32, #tpu.memory_space<vmem>>, %arg6: memref<4x32xf32, #tpu.memory_space<vmem>>, %arg7: memref<32x4xf32, #tpu.memory_space<vmem>>, %arg8: memref<32x16xf32, #tpu.memory_space<vmem>>, %arg9: memref<32x4xf32, #tpu.memory_space<vmem>>, %arg10: memref<32x16xf32, #tpu.memory_space<vmem>>, %arg11: memref<32x256xf32, #tpu.memory_space<vmem>>) attributes {dimension_semantics = [#tpu.dimension_semantics<parallel>], iteration_bounds = array<i64: 2>, scalar_prefetch = 0 : i64, scratch_operands = 0 : i64, tpu.core_type = #tpu.core_type<tc>, window_params = [{transform_indices = @transform_0, window_bounds = array<i64: 32, 256>}, {pipeline_mode = #tpu.pipeline_mode<synchronous>, transform_indices = @transform_1, window_bounds = array<i64: 256, 32>}, {pipeline_mode = #tpu.pipeline_mode<synchronous>, transform_indices = @transform_2, window_bounds = array<i64: 16, 256>}, {pipeline_mode = #tpu.pipeline_mode<synchronous>, transform_indices = @transform_3, window_bounds = array<i64: 16, 256>}, {pipeline_mode = #tpu.pipeline_mode<synchronous>, transform_indices = @transform_4, window_bounds = array<i64: 4, 32>}, {pipeline_mode = #tpu.pipeline_mode<synchronous>, transform_indices = @transform_5, window_bounds = array<i64: 4, 32>}, {pipeline_mode = #tpu.pipeline_mode<synchronous>, transform_indices = @transform_6, window_bounds = array<i64: 32, 4>}, {pipeline_mode = #tpu.pipeline_mode<synchronous>, transform_indices = @transform_7, window_bounds = array<i64: 32, 16>}, {pipeline_mode = #tpu.pipeline_mode<synchronous>, transform_indices = @transform_8, window_bounds = array<i64: 32, 4>}, {pipeline_mode = #tpu.pipeline_mode<synchronous>, transform_indices = @transform_9, window_bounds = array<i64: 32, 16>}, {transform_indices = @transform_10, window_bounds = array<i64: 32, 256>}]} {
    %c0 = arith.constant 0 : index
    %c0_0 = arith.constant 0 : index
    %0 = vector.load %arg1[%c0, %c0_0] : memref<32x256xf32, #tpu.memory_space<vmem>>, vector<32x256xf32>
    %c0_1 = arith.constant 0 : index
    %c0_2 = arith.constant 0 : index
    %1 = vector.load %arg2[%c0_1, %c0_2] : memref<256x32xf32, #tpu.memory_space<vmem>>, vector<256x32xf32>
    %cst = arith.constant dense<0.000000e+00> : vector<32x32xf32>
    %2 = tpu.matmul %0, %1, %cst {dimension_numbers = #tpu.dot_dimension_numbers<[1], [0], [0], [1], [0, 0, 1, 1], [], []>, precision = #tpu.contract_precision<fp32>} : vector<32x256xf32>, vector<256x32xf32>, vector<32x32xf32> -> vector<32x32xf32>
    %c0_3 = arith.constant 0 : index
    %c0_4 = arith.constant 0 : index
    %3 = vector.load %arg5[%c0_3, %c0_4] : memref<4x32xf32, #tpu.memory_space<vmem>>, vector<4x32xf32>
    %cst_5 = arith.constant dense<0.000000e+00> : vector<4x32xf32>
    %4 = tpu.matmul %3, %2, %cst_5 {dimension_numbers = #tpu.dot_dimension_numbers<[1], [0], [0], [1], [0, 0, 1, 1], [], []>, precision = #tpu.contract_precision<fp32>} : vector<4x32xf32>, vector<32x32xf32>, vector<4x32xf32> -> vector<4x32xf32>
    %c0_6 = arith.constant 0 : index
    %c0_7 = arith.constant 0 : index
    %5 = vector.load %arg6[%c0_6, %c0_7] : memref<4x32xf32, #tpu.memory_space<vmem>>, vector<4x32xf32>
    %6 = arith.addf %4, %5 : vector<4x32xf32>
    %cst_8 = arith.constant 0.000000e+00 : f32
    %7 = vector.broadcast %cst_8 : f32 to vector<4x32xf32>
    %8 = arith.maximumf %6, %7 : vector<4x32xf32>
    %c0_9 = arith.constant 0 : index
    %c0_10 = arith.constant 0 : index
    %9 = vector.load %arg7[%c0_9, %c0_10] : memref<32x4xf32, #tpu.memory_space<vmem>>, vector<32x4xf32>
    %10 = vector.extract_strided_slice %8 {offsets = [0, 0], sizes = [4, 16], strides = [1, 1]} : vector<4x32xf32> to vector<4x16xf32>
    %cst_11 = arith.constant dense<0.000000e+00> : vector<32x16xf32>
    %11 = tpu.matmul %9, %10, %cst_11 {dimension_numbers = #tpu.dot_dimension_numbers<[1], [0], [0], [1], [0, 0, 1, 1], [], []>, precision = #tpu.contract_precision<fp32>} : vector<32x4xf32>, vector<4x16xf32>, vector<32x16xf32> -> vector<32x16xf32>
    %c0_12 = arith.constant 0 : index
    %c0_13 = arith.constant 0 : index
    %12 = vector.load %arg8[%c0_12, %c0_13] : memref<32x16xf32, #tpu.memory_space<vmem>>, vector<32x16xf32>
    %13 = arith.addf %11, %12 : vector<32x16xf32>
    %14 = arith.negf %13 : vector<32x16xf32>
    %15 = math.exp %14 : vector<32x16xf32>
    %cst_14 = arith.constant 1.000000e+00 : f32
    %16 = vector.broadcast %cst_14 : f32 to vector<32x16xf32>
    %17 = arith.addf %16, %15 : vector<32x16xf32>
    %18 = arith.divf %16, %17 : vector<32x16xf32>
    %c0_15 = arith.constant 0 : index
    %c0_16 = arith.constant 0 : index
    %19 = vector.load %arg9[%c0_15, %c0_16] : memref<32x4xf32, #tpu.memory_space<vmem>>, vector<32x4xf32>
    %20 = vector.extract_strided_slice %8 {offsets = [0, 16], sizes = [4, 16], strides = [1, 1]} : vector<4x32xf32> to vector<4x16xf32>
    %cst_17 = arith.constant dense<0.000000e+00> : vector<32x16xf32>
    %21 = tpu.matmul %19, %20, %cst_17 {dimension_numbers = #tpu.dot_dimension_numbers<[1], [0], [0], [1], [0, 0, 1, 1], [], []>, precision = #tpu.contract_precision<fp32>} : vector<32x4xf32>, vector<4x16xf32>, vector<32x16xf32> -> vector<32x16xf32>
    %c0_18 = arith.constant 0 : index
    %c0_19 = arith.constant 0 : index
    %22 = vector.load %arg10[%c0_18, %c0_19] : memref<32x16xf32, #tpu.memory_space<vmem>>, vector<32x16xf32>
    %23 = arith.addf %21, %22 : vector<32x16xf32>
    %24 = arith.negf %23 : vector<32x16xf32>
    %25 = math.exp %24 : vector<32x16xf32>
    %cst_20 = arith.constant 1.000000e+00 : f32
    %26 = vector.broadcast %cst_20 : f32 to vector<32x16xf32>
    %27 = arith.addf %26, %25 : vector<32x16xf32>
    %28 = arith.divf %26, %27 : vector<32x16xf32>
    %c0_21 = arith.constant 0 : index
    %c0_22 = arith.constant 0 : index
    %29 = vector.load %arg3[%c0_21, %c0_22] : memref<16x256xf32, #tpu.memory_space<vmem>>, vector<16x256xf32>
    %cst_23 = arith.constant dense<0.000000e+00> : vector<32x256xf32>
    %30 = tpu.matmul %18, %29, %cst_23 {dimension_numbers = #tpu.dot_dimension_numbers<[1], [0], [0], [1], [0, 0, 1, 1], [], []>, precision = #tpu.contract_precision<fp32>} : vector<32x16xf32>, vector<16x256xf32>, vector<32x256xf32> -> vector<32x256xf32>
    %31 = arith.mulf %0, %30 : vector<32x256xf32>
    %c0_24 = arith.constant 0 : index
    %c0_25 = arith.constant 0 : index
    %32 = vector.load %arg4[%c0_24, %c0_25] : memref<16x256xf32, #tpu.memory_space<vmem>>, vector<16x256xf32>
    %cst_26 = arith.constant dense<0.000000e+00> : vector<32x256xf32>
    %33 = tpu.matmul %28, %32, %cst_26 {dimension_numbers = #tpu.dot_dimension_numbers<[1], [0], [0], [1], [0, 0, 1, 1], [], []>, precision = #tpu.contract_precision<fp32>} : vector<32x16xf32>, vector<16x256xf32>, vector<32x256xf32> -> vector<32x256xf32>
    %34 = arith.mulf %31, %33 : vector<32x256xf32>
    %c0_27 = arith.constant 0 : index
    %c0_28 = arith.constant 0 : index
    %35 = vector.load %arg11[%c0_27, %c0_28] : memref<32x256xf32, #tpu.memory_space<vmem>>, vector<32x256xf32>
    tpu.vector_store %arg11[%c0_27, %c0_28], %34 {strides = array<i32>} : memref<32x256xf32, #tpu.memory_space<vmem>>, vector<32x256xf32>,
    return
  }
  func.func @transform_0(%arg0: i32) -> (i32, i32) {
    %c0_i32 = arith.constant 0 : i32
    %c0_i32_0 = arith.constant 0 : i32
    return %arg0, %c0_i32 : i32, i32
  }
  func.func @transform_1(%arg0: i32) -> (i32, i32) {
    %c0_i32 = arith.constant 0 : i32
    %c0_i32_0 = arith.constant 0 : i32
    %c0_i32_1 = arith.constant 0 : i32
    return %c0_i32, %c0_i32_0 : i32, i32
  }
  func.func @transform_2(%arg0: i32) -> (i32, i32) {
    %c0_i32 = arith.constant 0 : i32
    %c0_i32_0 = arith.constant 0 : i32
    %c0_i32_1 = arith.constant 0 : i32
    return %c0_i32, %c0_i32_0 : i32, i32
  }
  func.func @transform_3(%arg0: i32) -> (i32, i32) {
    %c0_i32 = arith.constant 0 : i32
    %c0_i32_0 = arith.constant 0 : i32
    %c0_i32_1 = arith.constant 0 : i32
    return %c0_i32, %c0_i32_0 : i32, i32
  }
  func.func @transform_4(%arg0: i32) -> (i32, i32) {
    %c0_i32 = arith.constant 0 : i32
    %c0_i32_0 = arith.constant 0 : i32
    %c0_i32_1 = arith.constant 0 : i32
    return %c0_i32, %c0_i32_0 : i32, i32
  }
  func.func @transform_5(%arg0: i32) -> (i32, i32) {
    %c0_i32 = arith.constant 0 : i32
    %c0_i32_0 = arith.constant 0 : i32
    %c0_i32_1 = arith.constant 0 : i32
    return %c0_i32, %c0_i32_0 : i32, i32
  }
  func.func @transform_6(%arg0: i32) -> (i32, i32) {
    %c0_i32 = arith.constant 0 : i32
    %c0_i32_0 = arith.constant 0 : i32
    %c0_i32_1 = arith.constant 0 : i32
    return %c0_i32, %c0_i32_0 : i32, i32
  }
  func.func @transform_7(%arg0: i32) -> (i32, i32) {
    %c0_i32 = arith.constant 0 : i32
    %c0_i32_0 = arith.constant 0 : i32
    %c0_i32_1 = arith.constant 0 : i32
    return %c0_i32, %c0_i32_0 : i32, i32
  }
  func.func @transform_8(%arg0: i32) -> (i32, i32) {
    %c0_i32 = arith.constant 0 : i32
    %c0_i32_0 = arith.constant 0 : i32
    %c0_i32_1 = arith.constant 0 : i32
    return %c0_i32, %c0_i32_0 : i32, i32
  }
  func.func @transform_9(%arg0: i32) -> (i32, i32) {
    %c0_i32 = arith.constant 0 : i32
    %c0_i32_0 = arith.constant 0 : i32
    %c0_i32_1 = arith.constant 0 : i32
    return %c0_i32, %c0_i32_0 : i32, i32
  }
  func.func @transform_10(%arg0: i32) -> (i32, i32) {
    %c0_i32 = arith.constant 0 : i32
    %c0_i32_0 = arith.constant 0 : i32
    return %arg0, %c0_i32 : i32, i32
  }
}

</mosaic_0001>

<bundles_post_ra>
// kernel: tpu_custom_call.1
= control target key start
LH: loop header
LB: loop body
LE: loop exit
PB: predicated region body
PF: predicated region fallthrough
CT: control target
= control target key end

     0   :  { %s7641_s0 = inlined_call_operand.hbm [shape: f32[64,256], index: 0, kind: input, shape index: {}]   ;;  %s7642_s1 = inlined_call_operand.hbm [shape: f32[256,32], index: 1, kind: input, shape index: {}]   ;;  %s7643_s2 = inlined_call_operand.hbm [shape: f32[16,256], index: 2, kind: input, shape index: {}]   ;;  %s7644_s3 = inlined_call_operand.hbm [shape: f32[16,256], index: 3, kind: input, shape index: {}]   ;;  %s7645_s4 = inlined_call_operand.hbm [shape: f32[4,32], index: 4, kind: input, shape index: {}]   ;;  %s7646_s5 = inlined_call_operand.hbm [shape: f32[4,32], index: 5, kind: input, shape index: {}]   ;;  %s7647_s6 = inlined_call_operand.hbm [shape: f32[32,4], index: 6, kind: input, shape index: {}]   ;;  %s7648_s7 = inlined_call_operand.hbm [shape: f32[32,16], index: 7, kind: input, shape index: {}]   ;;  %s7649_s8 = inlined_call_operand.hbm [shape: f32[32,4], index: 8, kind: input, shape index: {}]   ;;  %s7650_s9 = inlined_call_operand.hbm [shape: f32[32,16], index: 9, kind: input, shape index: {}]   ;;  %s7651_s10 = inlined_call_operand.hbm [shape: f32[64,256], index: 10, kind: output, shape index: {}]  }
   0x1   :  { %7736 = sst [smem:[#allocation45_spill]] %s7642_s1 }
   0x2   :  { %7737 = sst [smem:[#allocation46_spill]] %s7643_s2 }
   0x3   :  { %7738 = sst [smem:[#allocation47_spill]] %s7644_s3 }
   0x4   :  { %7739 = sst [smem:[#allocation48_spill]] %s7651_s10 }
   0x5   :  { %15 = vsyncpa [#allocation3], 0 }
   0x6   :  { %17 = vsyncpa [#allocation3 + $0x1], 0 }
   0x7   :  { %18 = vsyncpa [#allocation6], 0 }
   0x8   :  { %19 = vsyncpa [#allocation9], 0 }
   0x9   :  { %20 = vsyncpa [#allocation12], 0 }
   0xa   :  { %21 = vsyncpa [#allocation15], 0 }
   0xb   :  { %22 = vsyncpa [#allocation18], 0 }
   0xc   :  { %23 = vsyncpa [#allocation4], 0 }
   0xd   :  { %25 = vsyncpa [#allocation4 + $0x1], 0  ;;  %s6433_s13 = smov 0   ;;  %s6435_s14 = smov 0  }
   0xe   :  { %s6437_s15 = smov 0   ;;  %s6439_s16 = smov 0  }
   0xf LB: > { %s6357_s17 = smov [#allocation5]   ;;  %s6454_s19 = sadd.s32 4294967295, %s6355_s16   ;;  %s6355_s16 = sphi %s6439_s16, %s7849_s16   ;;  %s6351_s15 = sphi %s6437_s15, %s7848_s15   ;;  %s6347_s14 = sphi %s6435_s14, %s7847_s14   ;;  %s6343_s13 = sphi %s6433_s13, %s7846_s13  }
  0x10   : > { %s289_s18 = sshll.u32 %s6357_s17, 4  ;;  %p4825_p0 = scmp.ge.s32.totalorder %s6355_s16, 1  ;;  %s6459_s18 = int_to_ptr.vmem [resolvable:$true] %s289_s18 }
  0x11   : > { %p7656_p1 = scmp.eq.s32.totalorder %s6454_s19, 0  ;;  %p277_p2 = scmp.lt.s32.totalorder %s6355_s16, 3 }
  0x12   : > { %s6358_s22 = smov [#allocation8]   ;;  %s6359_s24 = smov [#allocation11]  }
  0x13   : > { %p6461_p3 = pnand %p4825_p0, %p277_p2  ;;  %s315_s23 = sshll.u32 %s6358_s22, 4  ;;  %s6474_s23 = int_to_ptr.vmem [resolvable:$true] %s315_s23 }
  0x14   : > { %s6476_s25 = sshll.u32 %s6359_s24, 4  ;;  %s7743_s1 = sld [smem:[#allocation45_spill]]  ;;  %s341_s25 = int_to_ptr.vmem [resolvable:$true] %s6476_s25 }
  0x15   : > { %s7740_s20 = scalar_select %p6461_p3, 1, 0 }
  0x16   : > { %p5840_p5 = pneg %p6461_p3 }
  0x17   : > { %7741 = sst [smem:[#allocation27_spill]] %s7740_s20 }
  0x18   : > { %p6470_p6 = pnand %p5840_p5, %p7656_p1 }
  0x1a   : > { %s5987_s28 = scalar_lea.hbm %s7743_s1, 4096  ;;  %p6486_p8 = pneg %p6470_p6 }
  0x1b   : > { %p5988_p7 = scmp.ne.s32.totalorder %s7743_s1, %s5987_s28  ;;  %p5994_p11 = scmp.lt.u32.totalorder %s5987_s28, %s7743_s1 }
  0x1d   : > { %p5990_p9 = pnand %p6486_p8, %p5988_p7 }
  0x1f   : > { %p5991_p10 = pneg %p5990_p9 }
  0x21   : > { %p5996_p12 = pnand %p5994_p11, %p5991_p10 }
  0x23   : > { %5999 = shalt.err (!%p5996_p12)
}
  0x24   : > { %s6000_s22 = scalar_lea.vmem %s6459_s18, 4096  ;;  %p6008_p5 = scmp.lt.s32.totalorder %s6459_s18, %s6459_s18 }
  0x25   : > { %p6001_p13 = scmp.ne.s32.totalorder %s6459_s18, %s6000_s22  ;;  %p6009_p4 = scmp.lt.s32.totalorder %s6000_s22, %s6000_s22 }
  0x27   : > { %p6003_p0 = pnand %p6001_p13, %p6486_p8  ;;  %p6010_p7 = por %p6009_p4, %p6008_p5 }
  0x29   : > { %p6004_p2 = pneg %p6003_p0 }
  0x2b   : > { %p6011_p9 = pnand %p6010_p7, %p6004_p2 }
  0x2d   : > { %6014 = shalt.err (!%p6011_p9)
}
  0x2e   : > { %s7654_s24 = smov 128   ;;  %s7662_s26 = smov 8  }
  0x2f   : > { %5843 = dma.hbm_to_vmem [thread:$0]  (!%p6470_p6), %s7743_s1, 4096, %s6459_s18, [#allocation6], %s7654_s24, %s7654_s24, %s7662_s26  }
  0x30   : > { %s7745_s3 = sld [smem:[#allocation47_spill]] }
  0x36   : > { %s6015_s12 = scalar_lea.hbm %s7745_s3, 512 }
  0x37   : > { %p6016_p4 = scmp.ne.s32.totalorder %s7745_s3, %s6015_s12  ;;  %p6022_p12 = scmp.lt.u32.totalorder %s6015_s12, %s7745_s3 }
  0x39   : > { %p6018_p10 = pnand %p6016_p4, %p6486_p8 }
  0x3b   : > { %p6019_p11 = pneg %p6018_p10 }
  0x3d   : > { %p6024_p13 = pnand %p6022_p12, %p6019_p11 }
  0x3f   : > { %6027 = shalt.err (!%p6024_p13)
}
  0x40   : > { %s6028_s18 = scalar_lea.vmem %s6474_s23, 512  ;;  %p6036_p7 = scmp.lt.s32.totalorder %s6474_s23, %s6474_s23 }
  0x41   : > { %p6029_p0 = scmp.ne.s32.totalorder %s6474_s23, %s6028_s18  ;;  %p6037_p9 = scmp.lt.s32.totalorder %s6028_s18, %s6028_s18 }
  0x43   : > { %p6031_p2 = pnand %p6029_p0, %p6486_p8  ;;  %p6038_p4 = por %p6037_p9, %p6036_p7 }
  0x45   : > { %p6032_p5 = pneg %p6031_p2 }
  0x47   : > { %p6039_p10 = pnand %p6038_p4, %p6032_p5 }
  0x49   : > { %6042 = shalt.err (!%p6039_p10)
}
  0x4a   : > { %s7658_s27 = smov 256   ;;  %s7660_s10 = smov 16  }
  0x4b   : > { %5849 = dma.hbm_to_vmem [thread:$0]  (!%p6470_p6), %s7745_s3, 512, %s6474_s23, [#allocation9], %s7658_s27, %s7658_s27, %s7660_s10  }
  0x4c   : > { %s6043_s12 = scalar_lea.hbm %s7646_s5, 64 }
  0x4d   : > { %p6044_p11 = scmp.ne.s32.totalorder %s7646_s5, %s6043_s12  ;;  %p6050_p0 = scmp.lt.u32.totalorder %s6043_s12, %s7646_s5 }
  0x4f   : > { %p6046_p12 = pnand %p6044_p11, %p6486_p8 }
  0x51   : > { %p6047_p13 = pneg %p6046_p12 }
  0x53   : > { %p6052_p2 = pnand %p6050_p0, %p6047_p13 }
  0x55   : > { %6055 = shalt.err (!%p6052_p2)
}
  0x56   : > { %s6056_s20 = scalar_lea.vmem %s341_s25, 64  ;;  %p6064_p4 = scmp.lt.s32.totalorder %s341_s25, %s341_s25 }
  0x57   : > { %p6057_p5 = scmp.ne.s32.totalorder %s341_s25, %s6056_s20  ;;  %p6065_p10 = scmp.lt.s32.totalorder %s6056_s20, %s6056_s20 }
  0x59   : > { %p6059_p7 = pnand %p6057_p5, %p6486_p8  ;;  %p6066_p1 = por %p6065_p10, %p6064_p4 }
  0x5b   : > { %p6060_p9 = pneg %p6059_p7 }
  0x5d   : > { %p6067_p3 = pnand %p6066_p1, %p6060_p9 }
  0x5f   : > { %6070 = shalt.err (!%p6067_p3)
}
  0x60   : > { %5855 = dma.hbm_to_vmem [thread:$0]  (!%p6470_p6), %s7646_s5, 64, %s341_s25, [#allocation12]  }
  0x61   : > { %s6364_s24 = smov [#allocation14]   ;;  %s6365_s30 = smov [#allocation7]  }
  0x62   : > { %s363_s29 = sshll.u32 %s6364_s24, 4  ;;  %s302_s12 = sshll.u32 %s6365_s30, 4  ;;  %s364_s29 = int_to_ptr.vmem [resolvable:$true] %s363_s29  ;;  %s303_s12 = int_to_ptr.vmem [resolvable:$true] %s302_s12 }
  0x63   : > { %s6071_s18 = scalar_lea.hbm %s7648_s7, 512 }
  0x64   : > { %p6072_p1 = scmp.ne.s32.totalorder %s7648_s7, %s6071_s18  ;;  %p6078_p12 = scmp.lt.u32.totalorder %s6071_s18, %s7648_s7 }
  0x66   : > { %p6074_p3 = pnand %p6072_p1, %p6486_p8 }
  0x68   : > { %p6075_p11 = pneg %p6074_p3 }
  0x6a   : > { %p6080_p13 = pnand %p6078_p12, %p6075_p11 }
  0x6c   : > { %6083 = shalt.err (!%p6080_p13)
}
  0x6d   : > { %s6084_s25 = scalar_lea.vmem %s364_s29, 512  ;;  %p6092_p7 = scmp.lt.s32.totalorder %s364_s29, %s364_s29 }
  0x6e   : > { %p6085_p0 = scmp.ne.s32.totalorder %s364_s29, %s6084_s25  ;;  %p6093_p9 = scmp.lt.s32.totalorder %s6084_s25, %s6084_s25 }
  0x70   : > { %p6087_p2 = pnand %p6085_p0, %p6486_p8  ;;  %p6094_p4 = por %p6093_p9, %p6092_p7 }
  0x72   : > { %p6088_p5 = pneg %p6087_p2 }
  0x74   : > { %p6095_p10 = pnand %p6094_p4, %p6088_p5 }
  0x76   : > { %6098 = shalt.err (!%p6095_p10)
}
  0x77   : > { %s7746_s27 = smov 128   ;;  %s7747_s2 = sld [smem:[#allocation46_spill]] }
  0x78   : > { %5861 = dma.hbm_to_vmem [thread:$0]  (!%p6470_p6), %s7648_s7, 512, %s364_s29, [#allocation15], %s7746_s27, %s7746_s27, %s7662_s26  }
  0x7d   : > { %s6099_s17 = scalar_lea.hbm %s7747_s2, 512 }
  0x7e   : > { %p6100_p1 = scmp.ne.s32.totalorder %s7747_s2, %s6099_s17  ;;  %p6106_p12 = scmp.lt.u32.totalorder %s6099_s17, %s7747_s2 }
  0x80   : > { %p6102_p3 = pnand %p6100_p1, %p6486_p8 }
  0x82   : > { %p6103_p11 = pneg %p6102_p3 }
  0x84   : > { %p6108_p13 = pnand %p6106_p12, %p6103_p11 }
  0x86   : > { %6111 = shalt.err (!%p6108_p13)
}
  0x87   : > { %s6112_s25 = scalar_lea.vmem %s303_s12, 512  ;;  %p6120_p7 = scmp.lt.s32.totalorder %s303_s12, %s303_s12 }
  0x88   : > { %p6113_p0 = scmp.ne.s32.totalorder %s303_s12, %s6112_s25  ;;  %p6121_p9 = scmp.lt.s32.totalorder %s6112_s25, %s6112_s25 }
  0x8a   : > { %p6115_p2 = pnand %p6113_p0, %p6486_p8  ;;  %p6122_p4 = por %p6121_p9, %p6120_p7 }
  0x8c   : > { %p6116_p5 = pneg %p6115_p2 }
  0x8e   : > { %p6123_p10 = pnand %p6122_p4, %p6116_p5 }
  0x90   : > { %6126 = shalt.err (!%p6123_p10)
}
  0x91   : > { %s7748_s29 = smov 16   ;;  %s7749_s10 = smov 256  }
  0x92   : > { %5846 = dma.hbm_to_vmem [thread:$0]  (!%p6470_p6), %s7747_s2, 512, %s303_s12, [#allocation6], %s7749_s10, %s7749_s10, %s7748_s29  }
  0x93   : > { %s6366_s30 = smov [#allocation10]   ;;  %s6367_s22 = smov [#allocation13]  }
  0x94   : > { %s329_s17 = sshll.u32 %s6366_s30, 4  ;;  %s350_s18 = sshll.u32 %s6367_s22, 4  ;;  %s330_s17 = int_to_ptr.vmem [resolvable:$true] %s329_s17  ;;  %s351_s18 = int_to_ptr.vmem [resolvable:$true] %s350_s18 }
  0x95   : > { %s6127_s25 = scalar_lea.hbm %s7645_s4, 64 }
  0x96   : > { %p6128_p1 = scmp.ne.s32.totalorder %s7645_s4, %s6127_s25  ;;  %p6134_p12 = scmp.lt.u32.totalorder %s6127_s25, %s7645_s4 }
  0x98   : > { %p6130_p3 = pnand %p6128_p1, %p6486_p8 }
  0x9a   : > { %p6131_p11 = pneg %p6130_p3 }
  0x9c   : > { %p6136_p13 = pnand %p6134_p12, %p6131_p11 }
  0x9e   : > { %6139 = shalt.err (!%p6136_p13)
}
  0x9f   : > { %s6140_s12 = scalar_lea.vmem %s330_s17, 64  ;;  %p6148_p7 = scmp.lt.s32.totalorder %s330_s17, %s330_s17 }
  0xa0   : > { %p6141_p0 = scmp.ne.s32.totalorder %s330_s17, %s6140_s12  ;;  %p6149_p9 = scmp.lt.s32.totalorder %s6140_s12, %s6140_s12 }
  0xa2   : > { %p6143_p2 = pnand %p6141_p0, %p6486_p8  ;;  %p6150_p4 = por %p6149_p9, %p6148_p7 }
  0xa4   : > { %p6144_p5 = pneg %p6143_p2 }
  0xa6   : > { %p6151_p10 = pnand %p6150_p4, %p6144_p5 }
  0xa8   : > { %6154 = shalt.err (!%p6151_p10)
}
  0xa9   : > { %5852 = dma.hbm_to_vmem [thread:$0]  (!%p6470_p6), %s7645_s4, 64, %s330_s17, [#allocation9]  }
  0xaa   : > { %s6155_s30 = scalar_lea.hbm %s7647_s6, 512 }
  0xab   : > { %p6156_p1 = scmp.ne.s32.totalorder %s7647_s6, %s6155_s30  ;;  %p6162_p12 = scmp.lt.u32.totalorder %s6155_s30, %s7647_s6 }
  0xad   : > { %p6158_p3 = pnand %p6156_p1, %p6486_p8 }
  0xaf   : > { %p6159_p11 = pneg %p6158_p3 }
  0xb1   : > { %p6164_p13 = pnand %p6162_p12, %p6159_p11 }
  0xb3   : > { %6167 = shalt.err (!%p6164_p13)
}
  0xb4   : > { %s6168_s28 = scalar_lea.vmem %s351_s18, 512  ;;  %p6176_p7 = scmp.lt.s32.totalorder %s351_s18, %s351_s18 }
  0xb5   : > { %p6169_p0 = scmp.ne.s32.totalorder %s351_s18, %s6168_s28  ;;  %p6177_p9 = scmp.lt.s32.totalorder %s6168_s28, %s6168_s28 }
  0xb7   : > { %p6171_p2 = pnand %p6169_p0, %p6486_p8  ;;  %p6178_p4 = por %p6177_p9, %p6176_p7 }
  0xb9   : > { %p6172_p5 = pneg %p6171_p2 }
  0xbb   : > { %p6179_p10 = pnand %p6178_p4, %p6172_p5 }
  0xbd   : > { %6182 = shalt.err (!%p6179_p10)
}
  0xbe   : > { %s7750_s17 = smov 8   ;;  %s6368_s26 = smov [#allocation16]  }
  0xbf   : > { %5858 = dma.hbm_to_vmem [thread:$0]  (!%p6470_p6), %s7647_s6, 512, %s351_s18, [#allocation12], %s7746_s27, %s7746_s27, %s7750_s17  }
  0xc0   : > { %s376_s3 = sshll.u32 %s6368_s26, 4  ;;  %s6369_s24 = smov [#allocation17]   ;;  %s377_s3 = int_to_ptr.vmem [resolvable:$true] %s376_s3 }
  0xc1   : > { %s389_s30 = sshll.u32 %s6369_s24, 4  ;;  %s6183_s23 = scalar_lea.hbm %s7649_s8, 512  ;;  %s390_s30 = int_to_ptr.vmem [resolvable:$true] %s389_s30 }
  0xc2   : > { %p6184_p1 = scmp.ne.s32.totalorder %s7649_s8, %s6183_s23  ;;  %p6190_p12 = scmp.lt.u32.totalorder %s6183_s23, %s7649_s8 }
  0xc4   : > { %p6186_p3 = pnand %p6184_p1, %p6486_p8 }
  0xc6   : > { %p6187_p11 = pneg %p6186_p3 }
  0xc8   : > { %p6192_p13 = pnand %p6190_p12, %p6187_p11 }
  0xca   : > { %6195 = shalt.err (!%p6192_p13)
}
  0xcb   : > { %s6196_s18 = scalar_lea.vmem %s377_s3, 512  ;;  %p6204_p7 = scmp.lt.s32.totalorder %s377_s3, %s377_s3 }
  0xcc   : > { %p6197_p0 = scmp.ne.s32.totalorder %s377_s3, %s6196_s18  ;;  %p6205_p9 = scmp.lt.s32.totalorder %s6196_s18, %s6196_s18 }
  0xce   : > { %p6199_p2 = pnand %p6197_p0, %p6486_p8  ;;  %p6206_p4 = por %p6205_p9, %p6204_p7 }
  0xd0   : > { %p6200_p5 = pneg %p6199_p2 }
  0xd2   : > { %p6207_p10 = pnand %p6206_p4, %p6200_p5 }
  0xd4   : > { %6210 = shalt.err (!%p6207_p10)
}
  0xd5   : > { %5864 = dma.hbm_to_vmem [thread:$0]  (!%p6470_p6), %s7649_s8, 512, %s377_s3, [#allocation15], %s7746_s27, %s7746_s27, %s7750_s17  }
  0xd6   : > { %s6211_s22 = scalar_lea.hbm %s7650_s9, 512 }
  0xd7   : > { %p6212_p1 = scmp.ne.s32.totalorder %s7650_s9, %s6211_s22  ;;  %p6218_p12 = scmp.lt.u32.totalorder %s6211_s22, %s7650_s9 }
  0xd9   : > { %p6214_p3 = pnand %p6212_p1, %p6486_p8 }
  0xdb   : > { %p6215_p11 = pneg %p6214_p3 }
  0xdd   : > { %p6220_p13 = pnand %p6218_p12, %p6215_p11 }
  0xdf   : > { %6223 = shalt.err (!%p6220_p13)
}
  0xe0   : > { %s6224_s12 = scalar_lea.vmem %s390_s30, 512  ;;  %p6232_p7 = scmp.lt.s32.totalorder %s390_s30, %s390_s30 }
  0xe1   : > { %p6225_p0 = scmp.ne.s32.totalorder %s390_s30, %s6224_s12  ;;  %p6233_p9 = scmp.lt.s32.totalorder %s6224_s12, %s6224_s12 }
  0xe3   : > { %p6227_p2 = pnand %p6225_p0, %p6486_p8  ;;  %p6234_p4 = por %p6233_p9, %p6232_p7 }
  0xe5   : > { %p6228_p5 = pneg %p6227_p2 }
  0xe7   : > { %p6235_p10 = pnand %p6234_p4, %p6228_p5 }
  0xe9   : > { %6238 = shalt.err (!%p6235_p10)
}
  0xea   : > { %5867 = dma.hbm_to_vmem [thread:$0]  (!%p6470_p6), %s7650_s9, 512, %s390_s30, [#allocation18], %s7746_s27, %s7746_s27, %s7750_s17  }
  0xeb   : > { %s4824_s21 = sadd.s32 4294967294, %s6355_s16   ;;  %s6680_s11 = sadd.s32 1, %s6355_s16  }
  0xec   : > { %s38_s2 = sadd.s32 1, %s6351_s15  ;;  %s35_s1 = ssub.s32 %s6355_s16, %s6680_s11 }
  0xed   : > { %p45_p8 = scmp.ne.s32.totalorder %s6351_s15, %s6347_s14  ;;  %p36_p1 = scmp.eq.s32.totalorder %s35_s1, 0 }
  0xee   : > { %p46_p3 = scmp.eq.s32.totalorder %s6355_s16, 0  ;;  %p51_p11 = scmp.ne.s32.totalorder %s6347_s14, %s6343_s13 }
  0xef   : > { %p264_p12 = scmp.eq.s32.totalorder %s6454_s19, 1  ;;  %p7751_p0 = scmp.eq.s32.totalorder %s6454_s19, 0 }
  0xf0   : > { %s6692_s26 = scalar_select %p36_p1, %s6351_s15, %s38_s2  }
  0xf1   : > { %p47_p13 = por %p46_p3, %p45_p8  ;;  %p6696_p2 = por %p7751_p0, %p51_p11 }
  0xf2   : > { %p6700_p6 = por %p264_p12, %p45_p8  ;;  %p270_p5 = scmp.eq.s32.totalorder %s4824_s21, 1 }
  0xf3   : > { %p5885_p7 = scmp.lt.s32.totalorder %s6355_s16, 2  ;;  %s403_s17 = sand.u32 1, %s6351_s15  }
  0xf4   : > { %s7753_s27 = scalar_select %p6700_p6, 1, 0 }
  0xf5   : > { %p6706_p9 = por %p270_p5, %p51_p11  ;;  %s4836_s22 = sshll.u32 %s403_s17, 6 }
  0xf6   : > { %s4867_s20 = sshll.u32 %s6355_s16, 10  ;;  %s407_s12 = scalar_lea.vmem [#allocation2], %s4836_s22 }
  0xf7   : > { %s7754_s30 = scalar_select %p6706_p9, 1, 0 }
  0xf8   : > { %s6714_s28 = scalar_lea.hbm %s7641_s0, %s4867_s20  ;;  %s415_s3 = sshll.u32 %s407_s12, 4  ;;  %s6720_s3 = int_to_ptr.vmem [resolvable:$true] %s415_s3 }
  0xf9   : > { %p6716_p4 = pnand %p5885_p7, %p47_p13  ;;  %s6722_s21 = scalar_lea.sflag [#allocation3], %s403_s17 }
  0xfa   : > { %s6239_s2 = scalar_lea.hbm %s6714_s28, 1024  ;;  %s6244_s20 = scalar_lea.hbm %s7641_s0, 2048 }
  0xfb   : > { %p6240_p10 = scmp.ne.s32.totalorder %s6714_s28, %s6239_s2  ;;  %p6241_p8 = pneg %p6716_p4 }
  0xfc   : > { %p6245_p11 = scmp.lt.u32.totalorder %s6714_s28, %s7641_s0  ;;  %p6246_p12 = scmp.lt.u32.totalorder %s6244_s20, %s6239_s2 }
  0xfd   : > { %p6242_p1 = pnand %p6241_p8, %p6240_p10  ;;  %p6248_p0 = scmp.lt.u32.totalorder %s6239_s2, %s6714_s28 }
  0xfe   : > { %p6247_p13 = por %p6246_p12, %p6245_p11 }
  0xff   : > { %p6243_p3 = pneg %p6242_p1 }
 0x100   : > { %p6249_p5 = por %p6248_p0, %p6247_p13 }
 0x102   : > { %p6250_p7 = pnand %p6249_p5, %p6243_p3 }
 0x104   : > { %6253 = shalt.err (!%p6250_p7)
}
 0x105   : > { %s6254_s17 = scalar_lea.vmem %s6720_s3, 1024  ;;  %s6370_s12 = smov [#allocation2]  }
 0x106   : > { %p6255_p10 = scmp.ne.s32.totalorder %s6720_s3, %s6254_s17  ;;  %s6259_s1 = sshll.u32 %s6370_s12, 4  ;;  %s6260_s1 = int_to_ptr.vmem [resolvable:$false] %s6259_s1 }
 0x107   : > { %s6261_s22 = scalar_lea.vmem %s6260_s1, 2048  ;;  %p6262_p6 = scmp.lt.s32.totalorder %s6720_s3, %s6260_s1 }
 0x108   : > { %p6257_p1 = pnand %p6255_p10, %p6241_p8  ;;  %p6263_p11 = scmp.lt.s32.totalorder %s6261_s22, %s6254_s17 }
 0x10a   : > { %p6258_p9 = pneg %p6257_p1  ;;  %p6264_p12 = por %p6263_p11, %p6262_p6 }
 0x10c   : > { %p6265_p13 = pnand %p6264_p12, %p6258_p9 }
 0x10e   : > { %6268 = shalt.err (!%p6265_p13)
}
 0x10f   : > { %5871 = dma.hbm_to_vmem [thread:$0]  (!%p6716_p4), %s6714_s28, 1024, %s6720_s3, %s6722_s21, %s7749_s10, %s7749_s10, %s7748_s29  }
 0x110   : > { %s7756_s2 = sld [smem:[#allocation27_spill]] }
 0x116   : > { %p7757_p8 = scmp.ne.s32.totalorder %s7756_s2, 0 }
 0x118   : > { %427 = sbr.rel (%p7757_p8) target bundleno = 1636 (0x664), region = 60 }
 0x11f   : > { %s6756_s20 = sand.u32 1, %s6347_s14  }
 0x120   : > { %s4841_s23 = sshll.u32 %s6756_s20, 6  ;;  %s430_s25 = scalar_lea.sflag [#allocation3], %s6756_s20 }
 0x121   : > { %s6762_s18 = scalar_lea.vmem [#allocation2], %s4841_s23 }
 0x122   : > { %6314 = dma.done.wait (%p6696_p2), %s430_s25, 1024  }
 0x123   : > { %6316 = vsyncadd (%p6696_p2), %s430_s25, 4294966272  ;;  %p7758_p6 = scmp.eq.s32.totalorder %s6454_s19, 0 }
 0x125   : > { %6318 = dma.done.wait (%p7758_p6), [#allocation6], 4608   ;;  %p7759_p9 = pmov %p7758_p6 }
 0x126   : > { %p7760_p4 = pmov %p7758_p6 }
 0x127   : > { %6320 = vsyncadd (%p7759_p9), [#allocation6], 4294962688 }
 0x128   : > { %6322 = dma.done.wait (%p7760_p4), [#allocation9], 576   ;;  %p7761_p3 = pmov %p7760_p4 }
 0x12a   : > { %6324 = vsyncadd (%p7761_p3), [#allocation9], 4294966720  ;;  %p7762_p0 = pmov %p7761_p3 }
 0x12c   : > { %6326 = dma.done.wait (%p7762_p0), [#allocation12], 576   ;;  %p7763_p5 = pmov %p7762_p0 }
 0x12d   : > { %p7764_p2 = pmov %p7762_p0 }
 0x12e   : > { %6328 = vsyncadd (%p7763_p5), [#allocation12], 4294966720 }
 0x12f   : > { %6330 = dma.done.wait (%p7764_p2), [#allocation15], 1024   ;;  %p7765_p7 = pmov %p7762_p0 }
 0x130   : > { %p7766_p10 = pmov %p7762_p0 }
 0x131   : > { %6332 = vsyncadd (%p7765_p7), [#allocation15], 4294966272 }
 0x132   : > { %6334 = dma.done.wait (%p7766_p10), [#allocation18], 512   ;;  %p7767_p1 = pmov %p7762_p0 }
 0x133   : > { %v532_v0 = vld [vmem:[#allocation5 + $0x80] sm:$0xff]  ;;  %v533_v1 = vld [vmem:[#allocation5 + $0x88] sm:$0xff]  ;;  %v534_v7 = vld [vmem:[#allocation5 + $0x90] sm:$0xff]  ;;  %vm6372_vm0 = vmmov 0   ;;  %vm1580_vm1 = vcmask 261120   ;;  %vm2078_vm2 = vcmask 31744  }
 0x134   : > { %6336 = vsyncadd (%p7767_p1), [#allocation18], 4294966784  ;;  %v516_v2 = vld [vmem:[#allocation5] sm:$0xff]  ;;  %v597_v3 = vand.u32 4294901760, %v532_v0  ;;  %v600_v4 = vand.u32 4294901760, %v533_v1  ;;  %v517_v5 = vld [vmem:[#allocation5 + $0x8] sm:$0xff] }
 0x135   : > { %v549_v6 = vand.u32 4294901760, %v516_v2  ;;  %v535_v8 = vld [vmem:[#allocation5 + $0x98] sm:$0xff]  ;;  %v552_v9 = vand.u32 4294901760, %v517_v5  ;;  %v603_v10 = vand.u32 4294901760, %v534_v7  ;;  %v518_v12 = vld [vmem:[#allocation5 + $0x10] sm:$0xff]  ;;  %v536_v18 = vld [vmem:[#allocation5 + $0xa0] sm:$0xff] }
 0x136   : > { %v606_v11 = vand.u32 4294901760, %v535_v8  ;;  %v519_v13 = vld [vmem:[#allocation5 + $0x18] sm:$0xff]  ;;  %v6788_v14 = vpack.c.bf16 %v600_v4, %v597_v3  ;;  %v555_v16 = vand.u32 4294901760, %v518_v12  ;;  %v537_v19 = vld [vmem:[#allocation5 + $0xa8] sm:$0xff]  ;;  %v520_v23 = vld [vmem:[#allocation5 + $0x20] sm:$0xff]  ;;  %v609_v29 = vand.u32 4294901760, %v536_v18 }
 0x137   : > { %v6790_v15 = vsub.f32 %v516_v2, %v549_v6  ;;  %v558_v17 = vand.u32 4294901760, %v519_v13  ;;  %v6792_v20 = vpack.c.bf16 %v552_v9, %v549_v6  ;;  %v6794_v21 = vsub.f32 %v517_v5, %v552_v9  ;;  %v521_v24 = vld [vmem:[#allocation5 + $0x28] sm:$0xff]  ;;  %v538_v37 = vld [vmem:[#allocation5 + $0xb0] sm:$0xff]  ;;  %v539_v42 = vld [vmem:[#allocation5 + $0xb8] sm:$0xff]  ;;  %s6374_s29 = smov 112   ;;  %s7575_s10 = scalar_lea.vmem [#allocation19], %s4841_s23 }
 0x138   : > { %7768 = vst [vmem:[#allocation28_spill] sm:$0xff] %v6788_v14  ;;  %v6796_v22 = vpack.c.bf16 %v606_v11, %v603_v10  ;;  %5387 = vmatprep.subr.bf16.mxu0 %v6788_v14  ;;  %v6799_v25 = vsub.f32 %v534_v7, %v603_v10  ;;  %v6801_v26 = vsub.f32 %v535_v8, %v606_v11  ;;  %v612_v30 = vand.u32 4294901760, %v537_v19  ;;  %v522_v55 = vld [vmem:[#allocation5 + $0x30] sm:$0xff]  ;;  %v523_v56 = vld [vmem:[#allocation5 + $0x38] sm:$0xff]  ;;  %v540_v5 = vld [vmem:[#allocation5 + $0xc0] sm:$0xff]  ;;  %s4665_s24 = sshll.u32 %s7575_s10, 4  ;;  %s7589_s24 = int_to_ptr.vmem [resolvable:$true] %s4665_s24 }
 0x139   : > { %v6803_v27 = vpack.c.bf16 %v558_v17, %v555_v16  ;;  %v6805_v28 = vsub.f32 %v518_v12, %v555_v16  ;;  %5389 = vmatpush3.bf16.msra.mxu0 %v6792_v20  ;;  %v6808_v31 = vsub.f32 %v532_v0, %v597_v3  ;;  %v6810_v32 = vsub.f32 %v533_v1, %v600_v4  ;;  %v541_v6 = vld [vmem:[#allocation5 + $0xc8] sm:$0xff]  ;;  %v524_v11 = vld [vmem:[#allocation5 + $0x40] sm:$0xff]  ;;  %s4869_s28 = sshll.u32 %s6454_s19, 10  ;;  %s7842_s19 = sld [smem:[#allocation48_spill]] }
 0x13a   : > { %5391 = vmatprep.subr.bf16.mxu0 %v6796_v22  ;;  %v561_v33 = vand.u32 4294901760, %v520_v23  ;;  %v564_v34 = vand.u32 4294901760, %v521_v24  ;;  %v7681_v35 = vand.u32 4294901760, %v6790_v15  ;;  %v7679_v36 = vand.u32 4294901760, %v6794_v21  ;;  %s4651_s12 = scalar_lea.sflag [#allocation4], %s6756_s20  ;;  %s6269_s1 = scalar_lea.vmem %s7589_s24, 1024 }
 0x13b   : > { %v6815_v38 = vsub.f32 %v519_v13, %v558_v17  ;;  %v6817_v39 = vpack.c.bf16 %v612_v30, %v609_v29  ;;  %v6819_v40 = vsub.f32 %v536_v18, %v609_v29  ;;  %v7684_v41 = vand.u32 4294901760, %v6808_v31  ;;  %v525_v29 = vld [vmem:[#allocation5 + $0x48] sm:$0xff]  ;;  %p6270_p11 = scmp.ne.s32.totalorder %s7589_s24, %s6269_s1  ;;  %p7843_p12 = scmp.ne.s32.totalorder %s7753_s27, 0 }
 0x13c   : > { %v6822_v43 = vsub.f32 %v537_v19, %v612_v30  ;;  %v7683_v44 = vand.u32 4294901760, %v6810_v32  ;;  %v6825_v45 = vpack.c.bf16 %v564_v34, %v561_v33  ;;  %v6827_v46 = vsub.f32 %v520_v23, %v561_v33  ;;  %s6375_s22 = smov [#allocation19]  }
 0x13d   : > { %5393 = vmatpush3.bf16.msra.mxu0 %v6803_v27  ;;  %v821_v47 = vsub.f32 %v6808_v31, %v7684_v41  ;;  %v709_v48 = vsub.f32 %v6790_v15, %v7681_v35  ;;  %v716_v49 = vsub.f32 %v6794_v21, %v7679_v36  ;;  %v615_v50 = vand.u32 4294901760, %v538_v37  ;;  %v509_v41 = vld [vmem:[%s6762_s18 + $0x8] sm:$0xff]  ;;  %p6271_p13 = pnand %p6270_p11, %p7843_p12  ;;  %s6273_s2 = sshll.u32 %s6375_s22, 4  ;;  %s6274_s2 = int_to_ptr.vmem [resolvable:$false] %s6273_s2 }
 0x13e   : > { %5395 = vmatprep.subr.bf16.mxu0 %v6817_v39  ;;  %v828_v51 = vsub.f32 %v6810_v32, %v7683_v44  ;;  %v618_v52 = vand.u32 4294901760, %v539_v42  ;;  %v7677_v53 = vand.u32 4294901760, %v6799_v25  ;;  %v7675_v54 = vand.u32 4294901760, %v6801_v26  ;;  %s6275_s23 = scalar_lea.vmem %s6274_s2, 2048  ;;  %p6276_p6 = scmp.lt.s32.totalorder %s7589_s24, %s6274_s2 }
 0x13f   : > { %v822_v57 = vand.u32 4294901760, %v821_v47  ;;  %v6845_v58 = vsub.f32 %v521_v24, %v564_v34  ;;  %v710_v59 = vand.u32 4294901760, %v709_v48  ;;  %v717_v60 = vand.u32 4294901760, %v716_v49  ;;  %s7595_s17 = scalar_lea.hbm %s7842_s19, %s4869_s28  ;;  %p6272_p8 = pneg %p6271_p13 }
 0x140   : > { %v829_v61 = vand.u32 4294901760, %v828_v51  ;;  %v6847_v62 = vpack.c.bf16 %v618_v52, %v615_v50  ;;  %v6849_v63 = vsub.f32 %v538_v37, %v615_v50  ;;  %v835_v0 = vsub.f32 %v6799_v25, %v7677_v53  ;;  %p6277_p9 = scmp.lt.s32.totalorder %s6275_s23, %s6269_s1 }
 0x141   : > { %5397 = vmatpush3.bf16.msra.mxu0 %v6825_v45  ;;  %v5420_v1 = vpack.c.bf16 %v717_v60, %v710_v59  ;;  %v842_v2 = vsub.f32 %v6801_v26, %v7675_v54  ;;  %v567_v3 = vand.u32 4294901760, %v522_v55  ;;  %v570_v4 = vand.u32 4294901760, %v523_v56  ;;  %v543_v59 = vld [vmem:[#allocation5 + $0xd8] sm:$0xff] }
 0x142   : > { %v5418_v7 = vpack.c.bf16 %v829_v61, %v822_v57  ;;  %5399 = vmatprep.subr.bf16.mxu0 %v6847_v62  ;;  %v836_v8 = vand.u32 4294901760, %v835_v0  ;;  %v7674_v9 = vand.u32 4294901760, %v6805_v28  ;;  %v7672_v10 = vand.u32 4294901760, %v6815_v38  ;;  %v542_v57 = vld [vmem:[#allocation5 + $0xd0] sm:$0xff]  ;;  %v547_v54 = vld [vmem:[#allocation5 + $0xf8] sm:$0xff]  ;;  %p6278_p4 = por %p6277_p9, %p6276_p6 }
 0x143   : > { %v6861_v12 = vsub.f32 %v539_v42, %v618_v52  ;;  %v843_v13 = vand.u32 4294901760, %v842_v2  ;;  %v6863_v16 = vpack.c.bf16 %v570_v4, %v567_v3  ;;  %v6865_v17 = vsub.f32 %v522_v55, %v567_v3 }
 0x144   : > { %5419 = vmatprep.subr.bf16.mxu1 %v5418_v7  ;;  %v723_v18 = vsub.f32 %v6805_v28, %v7674_v9  ;;  %v730_v19 = vsub.f32 %v6815_v38, %v7672_v10  ;;  %v621_v23 = vand.u32 4294901760, %v540_v5  ;;  %v624_v24 = vand.u32 4294901760, %v541_v6  ;;  %v546_v9 = vld [vmem:[#allocation5 + $0xf0] sm:$0xff]  ;;  %p6279_p3 = pnand %p6278_p4, %p6272_p8 }
 0x145   : > { %5421 = vmatpush3.bf16.msra.mxu1 %v5420_v1  ;;  %v5422_v30 = vpack.c.bf16 %v843_v13, %v836_v8  ;;  %5401 = vmatpush3.bf16.msra.mxu0 %v6863_v16  ;;  %v7670_v33 = vand.u32 4294901760, %v6819_v40  ;;  %v7669_v34 = vand.u32 4294901760, %v6822_v43  ;;  %v573_v37 = vand.u32 4294901760, %v524_v11  ;;  %v526_v1 = vld [vmem:[#allocation5 + $0x50] sm:$0xff] }
 0x146   : > { %v6876_v42 = vsub.f32 %v523_v56, %v570_v4  ;;  %v724_v47 = vand.u32 4294901760, %v723_v18  ;;  %v731_v48 = vand.u32 4294901760, %v730_v19  ;;  %v6878_v49 = vpack.c.bf16 %v624_v24, %v621_v23  ;;  %v527_v18 = vld [vmem:[#allocation5 + $0x58] sm:$0xff] }
 0x147   : > { %5423 = vmatprep.subr.bf16.mxu1 %v5422_v30  ;;  %v6880_v50 = vsub.f32 %v540_v5, %v621_v23  ;;  %v849_v51 = vsub.f32 %v6819_v40, %v7670_v33  ;;  %v856_v52 = vsub.f32 %v6822_v43, %v7669_v34  ;;  %v576_v55 = vand.u32 4294901760, %v525_v29 }
 0x148   : > { %7769 = vst [vmem:[#allocation29_spill] sm:$0xff] %v6878_v49  ;;  %v5424_v56 = vpack.c.bf16 %v731_v48, %v724_v47  ;;  %5403 = vmatprep.subr.bf16.mxu0 %v6878_v49  ;;  %v6889_v60 = vsub.f32 %v541_v6, %v624_v24  ;;  %v7667_v61 = vand.u32 4294901760, %v6827_v46  ;;  %v7665_v0 = vand.u32 4294901760, %v6845_v58 }
 0x149   : > { %v850_v2 = vand.u32 4294901760, %v849_v51  ;;  %v857_v3 = vand.u32 4294901760, %v856_v52  ;;  %v6893_v4 = vpack.c.bf16 %v576_v55, %v573_v37  ;;  %v6895_v5 = vsub.f32 %v524_v11, %v573_v37 }
 0x14a   : > { %5425 = vmatpush3.bf16.msra.mxu1 %v5424_v56  ;;  %v737_v7 = vsub.f32 %v6827_v46, %v7667_v61  ;;  %v744_v6 = vsub.f32 %v6845_v58, %v7665_v0  ;;  %v627_v8 = vand.u32 4294901760, %v542_v57  ;;  %v630_v13 = vand.u32 4294901760, %v543_v59  ;;  %v545_v0 = vld [vmem:[#allocation5 + $0xe8] sm:$0xff] }
 0x14b   : > { %7770 = vst [vmem:[#allocation30_spill] sm:$0xff] %v6893_v4  ;;  %v5426_v19 = vpack.c.bf16 %v857_v3, %v850_v2  ;;  %5405 = vmatpush3.bf16.msra.mxu0 %v6893_v4  ;;  %v7666_v23 = vand.u32 4294901760, %v6849_v63  ;;  %v7668_v11 = vand.u32 4294901760, %v6861_v12  ;;  %v579_v24 = vand.u32 4294901760, %v526_v1  ;;  %v544_v3 = vld [vmem:[#allocation5 + $0xe0] sm:$0xff] }
 0x14c   : > { %v6906_v30 = vsub.f32 %v525_v29, %v576_v55  ;;  %v738_v37 = vand.u32 4294901760, %v737_v7  ;;  %v745_v47 = vand.u32 4294901760, %v744_v6  ;;  %v6908_v48 = vpack.c.bf16 %v630_v13, %v627_v8  ;;  %v528_v6 = vld [vmem:[#allocation5 + $0x60] sm:$0xff] }
 0x14d   : > { %5427 = vmatprep.subr.bf16.mxu1 %v5426_v19  ;;  %v6910_v51 = vsub.f32 %v542_v57, %v627_v8  ;;  %v863_v52 = vsub.f32 %v6849_v63, %v7666_v23  ;;  %v870_v56 = vsub.f32 %v6861_v12, %v7668_v11  ;;  %v582_v2 = vand.u32 4294901760, %v527_v18  ;;  %v529_v11 = vld [vmem:[#allocation5 + $0x68] sm:$0xff] }
 0x14e   : > { %7771 = vst [vmem:[#allocation31_spill] sm:$0xff] %v6908_v48  ;;  %v5428_v29 = vpack.c.bf16 %v745_v47, %v738_v37  ;;  %5407 = vmatprep.subr.bf16.mxu0 %v6908_v48  ;;  %v6919_v55 = vsub.f32 %v543_v59, %v630_v13  ;;  %v7671_v7 = vand.u32 4294901760, %v6865_v17  ;;  %v7673_v57 = vand.u32 4294901760, %v6876_v42 }
 0x14f   : > { %v864_v8 = vand.u32 4294901760, %v863_v52  ;;  %v871_v19 = vand.u32 4294901760, %v870_v56  ;;  %v6923_v23 = vpack.c.bf16 %v582_v2, %v579_v24  ;;  %v6925_v61 = vsub.f32 %v526_v1, %v579_v24 }
 0x150   : > { %5429 = vmatpush3.bf16.msra.mxu1 %v5428_v29  ;;  %v751_v37 = vsub.f32 %v6865_v17, %v7671_v7  ;;  %v758_v59 = vsub.f32 %v6876_v42, %v7673_v57  ;;  %v633_v13 = vand.u32 4294901760, %v544_v3  ;;  %v636_v47 = vand.u32 4294901760, %v545_v0 }
 0x151   : > { %7772 = vst [vmem:[#allocation32_spill] sm:$0xff] %v6923_v23  ;;  %v5430_v34 = vpack.c.bf16 %v871_v19, %v864_v8  ;;  %5409 = vmatpush3.bf16.msra.mxu0 %v6923_v23  ;;  %v7676_v52 = vand.u32 4294901760, %v6880_v50  ;;  %v7678_v1 = vand.u32 4294901760, %v6889_v60  ;;  %v585_v24 = vand.u32 4294901760, %v528_v6  ;;  %v515_v23 = vld [vmem:[%s6762_s18 + $0x38] sm:$0xff] }
 0x152   : > { %v6936_v56 = vsub.f32 %v527_v18, %v582_v2  ;;  %v752_v29 = vand.u32 4294901760, %v751_v37  ;;  %v759_v33 = vand.u32 4294901760, %v758_v59  ;;  %v6938_v7 = vpack.c.bf16 %v636_v47, %v633_v13  ;;  %v530_v37 = vld [vmem:[#allocation5 + $0x70] sm:$0xff] }
 0x153   : > { %5431 = vmatprep.subr.bf16.mxu1 %v5430_v34  ;;  %v6940_v10 = vsub.f32 %v544_v3, %v633_v13  ;;  %v877_v8 = vsub.f32 %v6880_v50, %v7676_v52  ;;  %v884_v19 = vsub.f32 %v6889_v60, %v7678_v1  ;;  %v588_v57 = vand.u32 4294901760, %v529_v11  ;;  %v531_v1 = vld [vmem:[#allocation5 + $0x78] sm:$0xff] }
 0x154   : > { %7773 = vst [vmem:[#allocation33_spill] sm:$0xff] %v6938_v7  ;;  %v5432_v18 = vpack.c.bf16 %v759_v33, %v752_v29  ;;  %5411 = vmatprep.subr.bf16.mxu0 %v6938_v7  ;;  %v6949_v2 = vsub.f32 %v545_v0, %v636_v47  ;;  %v7680_v34 = vand.u32 4294901760, %v6895_v5  ;;  %v7682_v3 = vand.u32 4294901760, %v6906_v30 }
 0x155   : > { %v878_v59 = vand.u32 4294901760, %v877_v8  ;;  %v885_v13 = vand.u32 4294901760, %v884_v19  ;;  %v6953_v52 = vpack.c.bf16 %v588_v57, %v585_v24  ;;  %v6955_v53 = vsub.f32 %v528_v6, %v585_v24 }
 0x156   : > { %5433 = vmatpush3.bf16.msra.mxu1 %v5432_v18  ;;  %v765_v33 = vsub.f32 %v6895_v5, %v7680_v34  ;;  %v772_v0 = vsub.f32 %v6906_v30, %v7682_v3  ;;  %v639_v47 = vand.u32 4294901760, %v546_v9  ;;  %v642_v29 = vand.u32 4294901760, %v547_v54 }
 0x157   : > { %7774 = vst [vmem:[#allocation34_spill] sm:$0xff] %v6953_v52  ;;  %v5434_v36 = vpack.c.bf16 %v885_v13, %v878_v59  ;;  %5413 = vmatpush3.bf16.msra.mxu0 %v6953_v52  ;;  %v7687_v8 = vand.u32 4294901760, %v6910_v51  ;;  %v7688_v6 = vand.u32 4294901760, %v6919_v55  ;;  %v591_v24 = vand.u32 4294901760, %v530_v37 }
 0x158   : > { %v6966_v19 = vsub.f32 %v529_v11, %v588_v57  ;;  %v766_v18 = vand.u32 4294901760, %v765_v33  ;;  %v773_v34 = vand.u32 4294901760, %v772_v0  ;;  %v6968_v35 = vpack.c.bf16 %v642_v29, %v639_v47 }
 0x159   : > { %5435 = vmatprep.subr.bf16.mxu1 %v5434_v36  ;;  %v6970_v3 = vsub.f32 %v546_v9, %v639_v47  ;;  %v891_v59 = vsub.f32 %v6910_v51, %v7687_v8  ;;  %v898_v13 = vsub.f32 %v6919_v55, %v7688_v6  ;;  %v594_v44 = vand.u32 4294901760, %v531_v1  ;;  %v508_v9 = vld [vmem:[%s6762_s18] sm:$0xff] }
 0x15a   : > { %7775 = vst [vmem:[#allocation35_spill] sm:$0xff] %v6968_v35  ;;  %v5436_v52 = vpack.c.bf16 %v773_v34, %v766_v18  ;;  %5415 = vmatprep.subr.bf16.mxu0 %v6968_v35  ;;  %v6980_v11 = vsub.f32 %v547_v54, %v642_v29  ;;  %v7689_v57 = vand.u32 4294901760, %v6925_v61  ;;  %v7690_v36 = vand.u32 4294901760, %v6936_v56 }
 0x15b   : > { %v892_v33 = vand.u32 4294901760, %v891_v59  ;;  %v899_v0 = vand.u32 4294901760, %v898_v13  ;;  %v6985_v47 = vpack.c.bf16 %v594_v44, %v591_v24  ;;  %v6987_v8 = vsub.f32 %v530_v37, %v591_v24 }
 0x15c   : > { %7776 = vst [vmem:[#allocation36_spill] sm:$0xff] %v6980_v11  ;;  %5437 = vmatpush3.bf16.msra.mxu1 %v5436_v52  ;;  %v779_v34 = vsub.f32 %v6925_v61, %v7689_v57  ;;  %v786_v54 = vsub.f32 %v6936_v56, %v7690_v36  ;;  %v6995_v29 = vand.u32 4294901760, %v509_v41  ;;  %v7693_v18 = vand.u32 4294901760, %v6940_v10 }
 0x15d   : > { %7777 = vst [vmem:[#allocation37_spill] sm:$0xff] %v6985_v47  ;;  %7778 = vst [vmem:[#allocation38_spill] sm:$0xff] %v6987_v8  ;;  %v5438_v6 = vpack.c.bf16 %v899_v0, %v892_v33  ;;  %5417 = vmatpush3.bf16.msra.mxu0 %v6985_v47  ;;  %v7700_v59 = vand.u32 4294901760, %v6949_v2  ;;  %v5450_v52 = vpack.c.bf16 %v6810_v32, %v6808_v31  ;;  %v7002_v37 = vand.u32 4294901760, %v508_v9 }
 0x15e   : > { %7779 = vst [vmem:[#allocation39_spill] sm:$0xff] %v6995_v29  ;;  %v780_v24 = vand.u32 4294901760, %v779_v34  ;;  %v787_v13 = vand.u32 4294901760, %v786_v54  ;;  %v7005_v57 = vsub.f32 %v509_v41, %v6995_v29  ;;  %v905_v36 = vsub.f32 %v6940_v10, %v7693_v18  ;;  %930 = vmatprep.mubr.f32.mxu1 %v6995_v29 }
 0x15f   : > { %7780 = vst [vmem:[#allocation40_spill] sm:$0xff] %v7002_v37  ;;  %5439 = vmatprep.subr.bf16.mxu1 %v5438_v6  ;;  %v912_v33 = vsub.f32 %v6949_v2, %v7700_v59  ;;  %5451 = vmatprep.subr.bf16.mxu0 %v5450_v52  ;;  %v7015_v0 = vsub.f32 %v508_v9, %v7002_v37  ;;  %v7698_v34 = vand.u32 4294901760, %v6955_v53  ;;  %v7699_v41 = vand.u32 4294901760, %v6966_v19 }
 0x160   : > { %v7019_v54 = vsub.f32 %v531_v1, %v594_v44  ;;  %v5440_v47 = vpack.c.bf16 %v787_v13, %v780_v24  ;;  %v7701_v18 = vand.u32 4294901760, %v7005_v57  ;;  %v906_v35 = vand.u32 4294901760, %v905_v36 }
 0x161   : > { %7781 = vst [vmem:[#allocation41_spill] sm:$0xff] %v7015_v0  ;;  %v913_v29 = vand.u32 4294901760, %v912_v33  ;;  %v7704_v6 = vand.u32 4294901760, %v7015_v0  ;;  %v793_v52 = vsub.f32 %v6955_v53, %v7698_v34  ;;  %v800_v9 = vsub.f32 %v6966_v19, %v7699_v41 }
 0x162   : > { %7782 = vst [vmem:[#allocation42_spill] sm:$0xff] %v7019_v54  ;;  %5441 = vmatpush3.bf16.msra.mxu1 %v5440_v47  ;;  %v647_v44 = vsub.f32 %v7005_v57, %v7701_v18  ;;  %v5452_v1 = vpack.c.bf16 %v6794_v21, %v6790_v15  ;;  %v7705_v36 = vand.u32 4294901760, %v6970_v3  ;;  %v7706_v24 = vand.u32 4294901760, %v6980_v11 }
 0x163   : > { %v5442_v13 = vpack.c.bf16 %v913_v29, %v906_v35  ;;  %v653_v33 = vsub.f32 %v7015_v0, %v7704_v6  ;;  %v794_v34 = vand.u32 4294901760, %v793_v52  ;;  %v801_v41 = vand.u32 4294901760, %v800_v9  ;;  %v511_v35 = vld [vmem:[%s6762_s18 + $0x18] sm:$0xff]  ;;  %v510_v0 = vld [vmem:[%s6762_s18 + $0x10] sm:$0xff] }
 0x164   : > { %v648_v47 = vand.u32 4294901760, %v647_v44  ;;  %v919_v59 = vsub.f32 %v6970_v3, %v7705_v36  ;;  %v926_v18 = vsub.f32 %v6980_v11, %v7706_v24  ;;  %v7709_v7 = vand.u32 4294901760, %v6987_v8 }
 0x165   : > { %5443 = vmatprep.subr.bf16.mxu1 %v5442_v13  ;;  %v654_v29 = vand.u32 4294901760, %v653_v33  ;;  %v5444_v6 = vpack.c.bf16 %v801_v41, %v794_v34  ;;  %v5454_v52 = vpack.c.bf16 %v6801_v26, %v6799_v25  ;;  %v7710_v9 = vand.u32 4294901760, %v7019_v54  ;;  %v513_v13 = vld [vmem:[%s6762_s18 + $0x28] sm:$0xff]  ;;  %v512_v33 = vld [vmem:[%s6762_s18 + $0x20] sm:$0xff] }
 0x166   : > { %649 = vmatprep.mubr.f32.mxu0 %v648_v47  ;;  %v920_v44 = vand.u32 4294901760, %v919_v59  ;;  %v927_v36 = vand.u32 4294901760, %v926_v18  ;;  %v807_v24 = vsub.f32 %v6987_v8, %v7709_v7  ;;  %v7057_v41 = vand.u32 4294901760, %v511_v35 }
 0x167   : > { %655 = vmatmul.mubr.f32.vlgmr.msra.gmra.mrb[0].mxu0 %v654_v29  ;;  %5445 = vmatpush3.bf16.msra.mxu1 %v5444_v6  ;;  %v814_v34 = vsub.f32 %v7019_v54, %v7710_v9  ;;  %v5456_v47 = vpack.c.bf16 %v6815_v38, %v6805_v28  ;;  %v5458_v6 = vpack.c.bf16 %v6822_v43, %v6819_v40  ;;  %v7068_v9 = vand.u32 4294901760, %v510_v0 }
 0x168   : > { %5453 = vmatpush3.bf16.msra.mxu0 %v5452_v1  ;;  %v5446_v59 = vpack.c.bf16 %v927_v36, %v920_v44  ;;  %v808_v18 = vand.u32 4294901760, %v807_v24  ;;  %v7066_v29 = vsub.f32 %v511_v35, %v7057_v41  ;;  %v7071_v48 = vand.u32 4294901760, %v513_v13  ;;  %v514_v36 = vld [vmem:[%s6762_s18 + $0x30] sm:$0xff] }
 0x169   : > { %5455 = vmatprep.subr.bf16.mxu0 %v5454_v52  ;;  %v815_v7 = vand.u32 4294901760, %v814_v34  ;;  %v7073_v1 = vand.u32 4294901760, %v512_v33  ;;  %v5460_v52 = vpack.c.bf16 %v6845_v58, %v6827_v46  ;;  %v7080_v34 = vsub.f32 %v510_v0, %v7068_v9 }
 0x16a   : > { %7783 = vst [vmem:[#allocation43_spill] sm:$0xff] %v7066_v29  ;;  %5447 = vmatprep.subr.bf16.mxu1 %v5446_v59  ;;  %v7721_v44 = vand.u32 4294901760, %v7066_v29  ;;  %v5462_v35 = vpack.c.bf16 %v6861_v12, %v6849_v63  ;;  %v7085_v59 = vsub.f32 %v513_v13, %v7071_v48  ;;  %v7090_v54 = vand.u32 4294901760, %v515_v23 }
 0x16b   : > { %v5448_v24 = vpack.c.bf16 %v815_v7, %v808_v18  ;;  %v7088_v4 = vsub.f32 %v512_v33, %v7073_v1  ;;  %v5464_v7 = vpack.c.bf16 %v6876_v42, %v6865_v17  ;;  %v7729_v18 = vand.u32 4294901760, %v7080_v34 }
 0x16c   : > { %5457 = vmatpush3.bf16.msra.mxu0 %v5456_v47  ;;  %v662_v0 = vsub.f32 %v7066_v29, %v7721_v44  ;;  %v7098_v47 = vand.u32 4294901760, %v514_v36  ;;  %v5466_v13 = vpack.c.bf16 %v6889_v60, %v6880_v50  ;;  %v7730_v33 = vand.u32 4294901760, %v7085_v59 }
 0x16d   : > { %7784 = vst [vmem:[#allocation44_spill] sm:$0xff] %v7088_v4  ;;  %5449 = vmatpush3.bf16.msra.mxu1 %v5448_v24  ;;  %5459 = vmatprep.subr.bf16.mxu0 %v5458_v6  ;;  %v7733_v6 = vand.u32 4294901760, %v7088_v4  ;;  %v7106_v24 = vsub.f32 %v515_v23, %v7090_v54  ;;  %v668_v44 = vsub.f32 %v7080_v34, %v7729_v18  ;;  %v7786_v49 = vand.u32 4294901760, %v6810_v32 }
 0x16e   : > { %5483 = vmatprep.subr.bf16.mxu1 %v6788_v14  ;;  %v663_v8 = vand.u32 4294901760, %v662_v0  ;;  %v7112_v29 = vsub.f32 %v514_v36, %v7098_v47  ;;  %v7785_v14 = vand.u32 4294901760, %v6808_v31  ;;  %v677_v23 = vsub.f32 %v7085_v59, %v7730_v33 }
 0x16f   : > { %v683_v0 = vsub.f32 %v7088_v4, %v7733_v6  ;;  %v7787_v18 = vand.u32 4294901760, %v6790_v15  ;;  %v7788_v31 = vand.u32 4294901760, %v6794_v21  ;;  %v7790_v33 = vand.u32 4294901760, %v6801_v26 }
 0x170   : > { %v7118_v11 = vpack.c.bf16 %v7786_v49, %v7785_v14  ;;  %932 = vmatmul.mubr.f32.vlgmr.msra.gmra.mrb[0].mxu1 %v7002_v37  ;;  %5461 = vmatpush3.bf16.msra.mxu0 %v5460_v52  ;;  %v669_v14 = vand.u32 4294901760, %v668_v44  ;;  %v697_v49 = vand.u32 4294901760, %v7112_v29  ;;  %v7789_v52 = vand.u32 4294901760, %v6799_v25 }
 0x171   : > { %v5516_v32 = vpack.c.bf16 %v7788_v31, %v7787_v18  ;;  %5485 = vmatpush3.bf16.msra.mxu1 %v6792_v20  ;;  %5463 = vmatprep.subr.bf16.mxu0 %v5462_v35  ;;  %v7791_v6 = vand.u32 4294901760, %v6805_v28  ;;  %v7792_v36 = vand.u32 4294901760, %v6815_v38  ;;  %v5468_v15 = vpack.c.bf16 %v6906_v30, %v6895_v5 }
 0x172   : > { %v5518_v37 = vpack.c.bf16 %v7790_v33, %v7789_v52  ;;  %5487 = vmatprep.subr.bf16.mxu1 %v6796_v22  ;;  %664 = vmatprep.mubr.f32.mxu0 %v663_v8  ;;  %v678_v21 = vand.u32 4294901760, %v677_v23  ;;  %v7793_v44 = vand.u32 4294901760, %v7106_v24  ;;  %v7794_v25 = vand.u32 4294901760, %v6819_v40 }
 0x173   : > { %v5520_v4 = vpack.c.bf16 %v7792_v36, %v7791_v6  ;;  %v7795_v26 = vand.u32 4294901760, %v6822_v43  ;;  %670 = vmatmul.mubr.f32.gmra.mrb[2].mxu0 %v669_v14  ;;  %v684_v28 = vand.u32 4294901760, %v683_v0  ;;  %937 = vmatprep.mubr.f32.mxu1 %v7057_v41  ;;  %v698_v38 = vsub.f32 %v7112_v29, %v697_v49 }
 0x174   : > { %v692_v35 = vsub.f32 %v7106_v24, %v7793_v44  ;;  %v7796_v8 = vand.u32 4294901760, %v6827_v46  ;;  %v7797_v33 = vand.u32 4294901760, %v6845_v58  ;;  %v7798_v23 = vand.u32 4294901760, %v6849_v63  ;;  %5465 = vmatpush3.bf16.msra.mxu0 %v5464_v7  ;;  %679 = vmatprep.mubr.f32.mxu0 %v678_v21 }
 0x175   : > { %v5522_v18 = vpack.c.bf16 %v7795_v26, %v7794_v25  ;;  %v7799_v40 = vand.u32 4294901760, %v6861_v12  ;;  %v7800_v0 = vand.u32 4294901760, %v6865_v17  ;;  %v7801_v31 = vand.u32 4294901760, %v6876_v42  ;;  %5489 = vmatpush3.bf16.msra.mxu1 %v6803_v27  ;;  %5467 = vmatprep.subr.bf16.mxu0 %v5466_v13  ;;  %v7812_v25 = vld [vmem:[#allocation42_spill] sm:$0xff] }
 0x176   : > { %v5524_v6 = vpack.c.bf16 %v7797_v33, %v7796_v8  ;;  %v693_v43 = vand.u32 4294901760, %v692_v35  ;;  %v7802_v52 = vand.u32 4294901760, %v6880_v50  ;;  %v7803_v46 = vand.u32 4294901760, %v6889_v60  ;;  %5491 = vmatprep.subr.bf16.mxu1 %v6817_v39  ;;  %939 = vmatmul.mubr.f32.gmra.mrb[2].mxu1 %v7068_v9  ;;  %v7811_v35 = vld [vmem:[#allocation38_spill] sm:$0xff]  ;;  %v7815_v8 = vld [vmem:[#allocation32_spill] sm:$0xff]  ;;  %v7816_v33 = vld [vmem:[#allocation33_spill] sm:$0xff] }
 0x177   : > { %v5526_v36 = vpack.c.bf16 %v7799_v40, %v7798_v23  ;;  %v5528_v14 = vpack.c.bf16 %v7801_v31, %v7800_v0  ;;  %v7804_v58 = vand.u32 4294901760, %v6895_v5  ;;  %v7805_v63 = vand.u32 4294901760, %v6906_v30  ;;  %685 = vmatmul.mubr.f32.gmra.mrb[4].mxu0 %v684_v28  ;;  %944 = vmatprep.mubr.f32.mxu1 %v7071_v48  ;;  %v7813_v28 = vld [vmem:[#allocation30_spill] sm:$0xff]  ;;  %v7817_v23 = vld [vmem:[#allocation41_spill] sm:$0xff]  ;;  %v7823_v31 = vld [vmem:[#allocation44_spill] sm:$0xff] }
 0x178   : > { %v7172_v44 = vpack.c.bf16 %v7803_v46, %v7802_v52  ;;  %v5470_v17 = vpack.c.bf16 %v6919_v55, %v6910_v51  ;;  %v7806_v42 = vand.u32 4294901760, %v6910_v51  ;;  %v7807_v50 = vand.u32 4294901760, %v6919_v55  ;;  %5469 = vmatpush3.bf16.msra.mxu0 %v5468_v15  ;;  %694 = vmatprep.mubr.f32.mxu0 %v693_v43  ;;  %v7808_v55 = vld [vmem:[#allocation36_spill] sm:$0xff]  ;;  %v7809_v15 = vld [vmem:[#allocation29_spill] sm:$0xff]  ;;  %v7819_v40 = vld [vmem:[#allocation34_spill] sm:$0xff] }
 0x179   : > { %v7178_v12 = vpack.c.bf16 %v7805_v63, %v7804_v58  ;;  %v699_v60 = vand.u32 4294901760, %v698_v38  ;;  %v5472_v5 = vpack.c.bf16 %v6936_v56, %v6925_v61  ;;  %5493 = vmatpush3.bf16.msra.mxu1 %v6825_v45  ;;  %v5474_v30 = vpack.c.bf16 %v6949_v2, %v6940_v10  ;;  %v7814_v38 = vld [vmem:[#allocation31_spill] sm:$0xff]  ;;  %v7821_v0 = vld [vmem:[#allocation37_spill] sm:$0xff] }
 0x17a   : > { %v7187_v7 = vpack.c.bf16 %v7807_v50, %v7806_v42  ;;  %5471 = vmatprep.subr.bf16.mxu0 %v5470_v17  ;;  %5495 = vmatprep.subr.bf16.mxu1 %v6847_v62  ;;  %v5476_v51 = vpack.c.bf16 %v6966_v19, %v6955_v53  ;;  %v5478_v13 = vpack.c.bf16 %v7808_v55, %v6970_v3  ;;  %v7810_v21 = vand.u32 4294901760, %v7005_v57  ;;  %v7820_v43 = vld [vmem:[#allocation35_spill] sm:$0xff] }
 0x17b   : > { %946 = vmatmul.mubr.f32.gmra.mrb[4].mxu1 %v7073_v1  ;;  %700 = vmatmul.mubr.f32.gmra.mrb[6].mxu0 %v699_v60  ;;  %v5480_v26 = vpack.c.bf16 %v7812_v25, %v7811_v35  ;;  %vm2091_vm3 = vcmask 1043456   ;;  %vm3321_vm4 = vcmask 130048  }
 0x17c   : > { %951 = vmatprep.mubr.f32.mxu1 %v7090_v54  ;;  %5473 = vmatpush3.bf16.msra.mxu0 %v5472_v5 }
 0x17d   : > { %1088 = vmatprep.mubr.f32.mxu0 %v7005_v57  ;;  %5497 = vmatpush3.bf16.msra.mxu1 %v6863_v16  ;;  %v7818_v57 = vld [vmem:[#allocation43_spill] sm:$0xff] }
 0x17e   : > { %5475 = vmatprep.subr.bf16.mxu0 %v5474_v30  ;;  %5499 = vmatprep.subr.bf16.mxu1 %v7809_v15 }
 0x17f   : > { %953 = vmatmul.mubr.f32.gmra.mrb[6].mxu1 %v7098_v47 }
 0x180   : > { %1222 = vmatprep.mubr.f32.mxu1 %v7810_v21  ;;  %5477 = vmatpush3.bf16.msra.mxu0 %v5476_v51 }
 0x181   : > { %5501 = vmatpush3.bf16.msra.mxu1 %v7813_v28  ;;  %5479 = vmatprep.subr.bf16.mxu0 %v5478_v13 }
 0x182   : > { %5503 = vmatprep.subr.bf16.mxu1 %v7814_v38 }
 0x184   : > { %5481 = vmatpush3.bf16.msra.mxu0 %v5480_v26 }
 0x185   : > { %5505 = vmatpush3.bf16.msra.mxu1 %v7815_v8  ;;  %5515 = vmatprep.subr.bf16.mxu0 %v7118_v11  ;;  %v7822_v11 = vld [vmem:[#allocation28_spill] sm:$0xff] }
 0x186   : > { %5507 = vmatprep.subr.bf16.mxu1 %v7816_v33 }
 0x187   : > { %1091 = vmatmul.mubr.f32.vlgmr.msra.gmra.mrb[8].mxu0 %v7817_v23 }
 0x188   : > { %5517 = vmatpush3.bf16.msra.mxu0 %v5516_v32  ;;  %1097 = vmatprep.mubr.f32.mxu0 %v7818_v57  ;;  %v7824_v32 = vand.u32 4294901760, %v7817_v23 }
 0x189   : > { %5509 = vmatpush3.bf16.msra.mxu1 %v7819_v40  ;;  %5519 = vmatprep.subr.bf16.mxu0 %v5518_v37  ;;  %v7825_v37 = vand.u32 4294901760, %v7818_v57 }
 0x18a   : > { %5511 = vmatprep.subr.bf16.mxu1 %v7820_v43 }
 0x18b   : > { %1100 = vmatmul.mubr.f32.gmra.mrb[10].mxu0 %v7080_v34 }
 0x18c   : > { %5521 = vmatpush3.bf16.msra.mxu0 %v5520_v4  ;;  %1106 = vmatprep.mubr.f32.mxu0 %v7085_v59  ;;  %v7826_v4 = vand.u32 4294901760, %v7080_v34  ;;  %v7831_v34 = vand.u32 4294901760, %v6936_v56 }
 0x18d   : > { %5513 = vmatpush3.bf16.msra.mxu1 %v7821_v0  ;;  %5523 = vmatprep.subr.bf16.mxu0 %v5522_v18  ;;  %v7827_v18 = vand.u32 4294901760, %v7085_v59  ;;  %v7833_v59 = vand.u32 4294901760, %v6940_v10  ;;  %v7837_v10 = vand.u32 4294901760, %v6970_v3  ;;  %v6371_v3 = vmov 0.0|0.0  }
 0x18e   : > { %5547 = vmatprep.subr.bf16.mxu1 %v7822_v11 }
 0x18f   : > { %1109 = vmatmul.mubr.f32.gmra.mrb[12].mxu0 %v7823_v31 }
 0x190   : > { %1226 = vmatmul.mubr.f32.vlgmr.msra.gmra.mrb[8].mxu1 %v7824_v32  ;;  %5525 = vmatpush3.bf16.msra.mxu0 %v5524_v6  ;;  %v7829_v6 = vand.u32 4294901760, %v7823_v31 }
 0x191   : > { %5549 = vmatpush3.bf16.msra.mxu1 %v6792_v20  ;;  %1115 = vmatprep.mubr.f32.mxu0 %v7106_v24  ;;  %v7828_v20 = vld [vmem:[#allocation39_spill] sm:$0xff] }
 0x192   : > { %1233 = vmatprep.mubr.f32.mxu1 %v7825_v37  ;;  %5527 = vmatprep.subr.bf16.mxu0 %v5526_v36 }
 0x193   : > { %1118 = vmatmul.mubr.f32.gmra.mrb[14].mxu0 %v7112_v29  ;;  %5551 = vmatprep.subr.bf16.mxu1 %v6796_v22  ;;  %v7830_v22 = vand.u32 4294901760, %v6925_v61  ;;  %v7835_v61 = vand.u32 4294901760, %v6955_v53  ;;  %v7840_v53 = vand.u32 4294901760, %v7812_v25 }
 0x194   : > { %1237 = vmatmul.mubr.f32.gmra.mrb[10].mxu1 %v7826_v4  ;;  %5529 = vmatpush3.bf16.msra.mxu0 %v5528_v14 }
 0x195   : > { %5553 = vmatpush3.bf16.msra.mxu1 %v6803_v27  ;;  %1244 = vmatprep.mubr.f32.mxu1 %v7827_v18  ;;  %v5536_v36 = vpack.c.bf16 %v7831_v34, %v7830_v22  ;;  %v7832_v27 = vand.u32 4294901760, %v7106_v24 }
 0x196   : > { %5531 = vmatprep.subr.bf16.mxu0 %v7172_v44  ;;  %5555 = vmatprep.subr.bf16.mxu1 %v6817_v39  ;;  %v7834_v39 = vand.u32 4294901760, %v6949_v2  ;;  %v7838_v2 = vand.u32 4294901760, %v7808_v55 }
 0x197   : > { %1425 = vmatprep.mubr.f32.mxu0 %v7828_v20 }
 0x198   : > { %1248 = vmatmul.mubr.f32.gmra.mrb[12].mxu1 %v7829_v6  ;;  %5533 = vmatpush3.bf16.msra.mxu0 %v7178_v12  ;;  %v5538_v14 = vpack.c.bf16 %v7834_v39, %v7833_v59  ;;  %v5542_v24 = vpack.c.bf16 %v7838_v2, %v7837_v10 }
 0x199   : > { %5557 = vmatpush3.bf16.msra.mxu1 %v6825_v45  ;;  %1255 = vmatprep.mubr.f32.mxu1 %v7832_v27  ;;  %v7836_v45 = vand.u32 4294901760, %v6966_v19  ;;  %v6373_v19 = vmov 0.0  }
 0x19a   : > { %5535 = vmatprep.subr.bf16.mxu0 %v7187_v7  ;;  %5559 = vmatprep.subr.bf16.mxu1 %v6847_v62  ;;  %v7839_v62 = vand.u32 4294901760, %v7811_v35 }
 0x19b   : > { %v5540_v56 = vpack.c.bf16 %v7836_v45, %v7835_v61 }
 0x19c   : > { %1259 = vmatmul.mubr.f32.gmra.mrb[14].mxu1 %v697_v49  ;;  %5537 = vmatpush3.bf16.msra.mxu0 %v5536_v36  ;;  %v5544_v29 = vpack.c.bf16 %v7840_v53, %v7839_v62 }
 0x19d   : > { %5561 = vmatpush3.bf16.msra.mxu1 %v6863_v16  ;;  %5539 = vmatprep.subr.bf16.mxu0 %v5538_v14  ;;  %v7841_v16 = vld [vmem:[#allocation40_spill] sm:$0xff] }
 0x19e   : > { %5563 = vmatprep.subr.bf16.mxu1 %v7809_v15  ;;  %1550 = vmatprep.mubr.f32.mxu1 %v7828_v20 }
 0x1a0   : > { %5541 = vmatpush3.bf16.msra.mxu0 %v5540_v56 }
 0x1a1   : > { %5565 = vmatpush3.bf16.msra.mxu1 %v7813_v28  ;;  %5543 = vmatprep.subr.bf16.mxu0 %v5542_v24 }
 0x1a2   : > { %5567 = vmatprep.subr.bf16.mxu1 %v7814_v38 }
 0x1a4   : > { %5545 = vmatpush3.bf16.msra.mxu0 %v5544_v29 }
 0x1a5   : > { %5569 = vmatpush3.bf16.msra.mxu1 %v7815_v8  ;;  %5584 = vmatprep.subr.bf16.mxu0 %v6371_v3 }
 0x1a6   : > { %5571 = vmatprep.subr.bf16.mxu1 %v7816_v33 }
 0x1a7   : > { %1427 = vmatmul.mubr.f32.vlgmr.msra.gmra.mrb[16].mxu0 %v7841_v16 }
 0x1a8   : > { %1432 = vmatprep.mubr.f32.mxu0 %v7057_v41 }
 0x1a9   : > { %5573 = vmatpush3.bf16.msra.mxu1 %v7819_v40 }
 0x1aa   : > { %5575 = vmatprep.subr.bf16.mxu1 %v7820_v43 }
 0x1ab   : > { %1434 = vmatmul.mubr.f32.gmra.mrb[18].mxu0 %v7068_v9 }
 0x1ac   : > { %1439 = vmatprep.mubr.f32.mxu0 %v7071_v48 }
 0x1ad   : > { %5577 = vmatpush3.bf16.msra.mxu1 %v7821_v0 }
 0x1ae   : > { %5578 = vmatprep.subr.bf16.mxu1 %v6371_v3 }
 0x1af   : > { %1441 = vmatmul.mubr.f32.gmra.mrb[20].mxu0 %v7073_v1 }
 0x1b0   : > { %1552 = vmatmul.mubr.f32.vlgmr.msra.gmra.mrb[16].mxu1 %v7841_v16  ;;  %1446 = vmatprep.mubr.f32.mxu0 %v7090_v54 }
 0x1b1   : > { %1557 = vmatprep.mubr.f32.mxu1 %v7057_v41 }
 0x1b3   : > { %1448 = vmatmul.mubr.f32.gmra.mrb[22].mxu0 %v7098_v47 }
 0x1b4   : > { %1559 = vmatmul.mubr.f32.gmra.mrb[18].mxu1 %v7068_v9  ;;  %5243 = vmatprep.mubr.msk.f32.mxu0 %vm6372_vm0, %v6373_v19 }
 0x1b5   : > { %1564 = vmatprep.mubr.f32.mxu1 %v7071_v48 }
 0x1b8   : > { %1566 = vmatmul.mubr.f32.gmra.mrb[20].mxu1 %v7073_v1 }
 0x1b9   : > { %1571 = vmatprep.mubr.f32.mxu1 %v7090_v54 }
 0x1bc   : > { %1573 = vmatmul.mubr.f32.gmra.mrb[22].mxu1 %v7098_v47 }
 0x1bd   : > { %5232 = vmatprep.mubr.msk.f32.mxu1 %vm6372_vm0, %v6373_v19 }
 0x23a   : > { %v4902_v48 = vpop.f32.mrb[0].mxu0 }
 0x23b   : > { %v4903_v9 = vpop.f32.mrb[1].mxu0 }
 0x23c   : > { %v4904_v41 = vadd.f32 %v4903_v9, %v4902_v48 }
 0x243   : > { %v4946_v1 = vpop.f32.mrb[0].mxu1 }
 0x244   : > { %v4947_v54 = vpop.f32.mrb[1].mxu1 }
 0x245   : > { %v4948_v49 = vadd.f32 %v4947_v54, %v4946_v1 }
 0x246   : > { %v4905_v47 = vpop.f32.mrb[2].mxu0 }
 0x247   : > { %v934_v52 = vadd.f32 %v4948_v49, %v4904_v41  ;;  %v4906_v46 = vpop.f32.mrb[3].mxu0 }
 0x248   : > { %v4907_v44 = vadd.f32 %v4906_v46, %v4905_v47 }
 0x249   : > { %v4949_v58 = vpop.f32.mrb[2].mxu1 }
 0x24a   : > { %v4950_v63 = vpop.f32.mrb[3].mxu1  ;;  %v4908_v12 = vpop.f32.mrb[4].mxu0 }
 0x24b   : > { %v4951_v17 = vadd.f32 %v4950_v63, %v4949_v58  ;;  %v4909_v42 = vpop.f32.mrb[5].mxu0 }
 0x24c   : > { %v4910_v50 = vadd.f32 %v4909_v42, %v4908_v12 }
 0x24d   : > { %v941_v7 = vadd.f32 %v4951_v17, %v4907_v44 }
 0x24e   : > { %v4952_v60 = vpop.f32.mrb[4].mxu1  ;;  %v4911_v5 = vpop.f32.mrb[6].mxu0 }
 0x24f   : > { %v4953_v30 = vpop.f32.mrb[5].mxu1  ;;  %v4912_v51 = vpop.f32.mrb[7].mxu0 }
 0x250   : > { %v4954_v55 = vadd.f32 %v4953_v30, %v4952_v60  ;;  %v4913_v13 = vadd.f32 %v4912_v51, %v4911_v5  ;;  %v1578_v30 = vld [vmem:[#allocation10] sm:$0xf] }
 0x252   : > { %v948_v15 = vadd.f32 %v4954_v55, %v4910_v50  ;;  %v4955_v21 = vpop.f32.mrb[6].mxu1 }
 0x253   : > { %v4956_v35 = vpop.f32.mrb[7].mxu1 }
 0x254   : > { %v4957_v25 = vadd.f32 %v4956_v35, %v4955_v21 }
 0x256   : > { %v955_v26 = vadd.f32 %v4957_v25, %v4913_v13  ;;  %v1582_v25 = vsel %vm1580_vm1, %v1578_v30, 0 }
 0x25a   : > { %v4990_v28 = vpop.f32.mrb[8].mxu0 }
 0x25b   : > { %v4991_v38 = vpop.f32.mrb[9].mxu0 }
 0x25c   : > { %v4992_v8 = vadd.f32 %v4991_v38, %v4990_v28 }
 0x25e   : > { %v1093_v33 = vadd.f32 %v4992_v8, %v934_v52  ;;  %v4993_v23 = vpop.f32.mrb[10].mxu0 }
 0x25f   : > { %v4994_v57 = vpop.f32.mrb[11].mxu0 }
 0x260   : > { %v4995_v40 = vadd.f32 %v4994_v57, %v4993_v23 }
 0x262   : > { %v1102_v43 = vadd.f32 %v4995_v40, %v941_v7  ;;  %v4996_v0 = vpop.f32.mrb[12].mxu0 }
 0x263   : > { %v5034_v11 = vpop.f32.mrb[8].mxu1  ;;  %v4997_v31 = vpop.f32.mrb[13].mxu0 }
 0x264   : > { %v4998_v32 = vadd.f32 %v4997_v31, %v4996_v0  ;;  %v5035_v37 = vpop.f32.mrb[9].mxu1 }
 0x265   : > { %v5036_v4 = vadd.f32 %v5035_v37, %v5034_v11 }
 0x266   : > { %v1111_v18 = vadd.f32 %v4998_v32, %v948_v15  ;;  %v4999_v20 = vpop.f32.mrb[14].mxu0 }
 0x267   : > { %v1228_v6 = vadd.f32 %v5036_v4, %v1093_v33  ;;  %v5037_v22 = vpop.f32.mrb[10].mxu1  ;;  %v5000_v34 = vpop.f32.mrb[15].mxu0  ;;  %v7302_v33 = vand.u32 4294901760, %v1582_v25 }
 0x268   : > { %v5001_v36 = vadd.f32 %v5000_v34, %v4999_v20  ;;  %v5038_v27 = vpop.f32.mrb[11].mxu1 }
 0x269   : > { %v5039_v59 = vadd.f32 %v5038_v27, %v5037_v22  ;;  %v1654_v11 = vsub.f32 %v1582_v25, %v7302_v33 }
 0x26a   : > { %v1120_v39 = vadd.f32 %v5001_v36, %v955_v26 }
 0x26b   : > { %v1239_v14 = vadd.f32 %v5039_v59, %v1102_v43  ;;  %v5040_v61 = vpop.f32.mrb[12].mxu1  ;;  %v1655_v20 = vand.u32 4294901760, %v1654_v11 }
 0x26c   : > { %v5041_v45 = vpop.f32.mrb[13].mxu1 }
 0x26d   : > { %v5042_v56 = vadd.f32 %v5041_v45, %v5040_v61  ;;  %v1656_v27 = vsub.f32 %v1654_v11, %v1655_v20 }
 0x26f   : > { %v1250_v10 = vadd.f32 %v5042_v56, %v1111_v18  ;;  %v5043_v2 = vpop.f32.mrb[14].mxu1 }
 0x270   : > { %v5044_v24 = vpop.f32.mrb[15].mxu1 }
 0x271   : > { %v5045_v62 = vadd.f32 %v5044_v24, %v5043_v2  ;;  %v1657_v2 = vand.u32 4294901760, %v1656_v27 }
 0x273   : > { %v1261_v53 = vadd.f32 %v5045_v62, %v1120_v39 }
 0x27a   : > { %v5078_v29 = vpop.f32.mrb[16].mxu0 }
 0x27b   : > { %v5079_v16 = vpop.f32.mrb[17].mxu0 }
 0x27c   : > { %v5080_v48 = vadd.f32 %v5079_v16, %v5078_v29 }
 0x27e   : > { %v1429_v9 = vadd.f32 %v5080_v48, %v1228_v6  ;;  %v5081_v41 = vpop.f32.mrb[18].mxu0 }
 0x27f   : > { %v5082_v1 = vpop.f32.mrb[19].mxu0 }
 0x280   : > { %v5083_v54 = vadd.f32 %v5082_v1, %v5081_v41  ;;  %v2070_v1 = vld [vmem:[#allocation13] sm:$0xff] }
 0x282   : > { %v1436_v49 = vadd.f32 %v5083_v54, %v1239_v14  ;;  %v5084_v47 = vpop.f32.mrb[20].mxu0  ;;  %v2080_v54 = vsel %vm2078_vm2, %v2070_v1, 0 }
 0x283   : > { %v5122_v52 = vpop.f32.mrb[16].mxu1  ;;  %v5085_v46 = vpop.f32.mrb[21].mxu0 }
 0x284   : > { %v5086_v44 = vadd.f32 %v5085_v46, %v5084_v47  ;;  %v5123_v58 = vpop.f32.mrb[17].mxu1 }
 0x285   : > { %v5124_v63 = vadd.f32 %v5123_v58, %v5122_v52 }
 0x286   : > { %v1443_v12 = vadd.f32 %v5086_v44, %v1250_v10  ;;  %v5087_v17 = vpop.f32.mrb[22].mxu0 }
 0x287   : > { %v1554_v42 = vadd.f32 %v5124_v63, %v1429_v9  ;;  %v5125_v50 = vpop.f32.mrb[18].mxu1  ;;  %v5088_v7 = vpop.f32.mrb[23].mxu0  ;;  %v2071_v63 = vld [vmem:[#allocation13 + $0x8] sm:$0xff] }
 0x288   : > { %v5089_v60 = vadd.f32 %v5088_v7, %v5087_v17  ;;  %v5126_v5 = vpop.f32.mrb[19].mxu1  ;;  %v2694_v17 = vld [vmem:[#allocation16] sm:$0xff] }
 0x289   : > { %v1585_v51 = vand.u32 4294901760, %v1554_v42  ;;  %v5127_v55 = vadd.f32 %v5126_v5, %v5125_v50  ;;  %v2083_v50 = vsel %vm2078_vm2, %v2071_v63, 0  ;;  %v2073_v5 = vld [vmem:[#allocation13 + $0x18] sm:$0xff] }
 0x28a   : > { %v1450_v13 = vadd.f32 %v5089_v60, %v1261_v53 }
 0x28b   : > { %v1665_v15 = vsub.f32 %v1554_v42, %v1585_v51  ;;  %v1561_v21 = vadd.f32 %v5127_v55, %v1436_v49  ;;  %v5128_v35 = vpop.f32.mrb[20].mxu1  ;;  %v7327_v49 = vand.u32 4294901760, %v2080_v54  ;;  %v2705_v42 = vsel %vm2078_vm2, %v2694_v17, 0 }
 0x28c   : > { %v5129_v26 = vpop.f32.mrb[21].mxu1  ;;  %v7338_v7 = vand.u32 4294901760, %v2705_v42 }
 0x28d   : > { %v1666_v28 = vand.u32 4294901760, %v1665_v15  ;;  %v1588_v38 = vand.u32 4294901760, %v1561_v21  ;;  %v5130_v8 = vadd.f32 %v5129_v26, %v5128_v35  ;;  %v7330_v47 = vsub.f32 %v2080_v54, %v7327_v49  ;;  %v1579_v35 = vld [vmem:[#allocation11] sm:$0xf] }
 0x28e   : > { %v7342_v30 = vsub.f32 %v2705_v42, %v7338_v7 }
 0x28f   : > { %v5579_v23 = vpack.c.bf16 %v1588_v38, %v1585_v51  ;;  %v1672_v57 = vsub.f32 %v1561_v21, %v1588_v38  ;;  %v1568_v40 = vadd.f32 %v5130_v8, %v1443_v12  ;;  %v5131_v43 = vpop.f32.mrb[22].mxu1  ;;  %v1667_v31 = vsub.f32 %v1665_v15, %v1666_v28  ;;  %v2072_v12 = vld [vmem:[#allocation13 + $0x10] sm:$0xff] }
 0x290   : > { %v5132_v0 = vpop.f32.mrb[23].mxu1  ;;  %v2163_v52 = vand.u32 4294901760, %v7330_v47  ;;  %v2086_v60 = vsel %vm2078_vm2, %v2072_v12, 0  ;;  %v7344_v51 = vand.u32 4294901760, %v2083_v50 }
 0x291   : > { %v1673_v32 = vand.u32 4294901760, %v1672_v57  ;;  %v1591_v37 = vand.u32 4294901760, %v1568_v40  ;;  %v5133_v4 = vadd.f32 %v5132_v0, %v5131_v43  ;;  %5580 = vmatpush3.bf16.msra.mxu1 %v5579_v23  ;;  %v5591_v18 = vpack.c.bf16 %v1672_v57, %v1665_v15 }
 0x292   : > { %5581 = vmatprep.subr.bf16.mxu1 %v6371_v3  ;;  %v1668_v14 = vand.u32 4294901760, %v1667_v31  ;;  %v2164_v46 = vsub.f32 %v7330_v47, %v2163_v52  ;;  %v7346_v55 = vand.u32 4294901760, %v2086_v60  ;;  %v2786_v15 = vand.u32 4294901760, %v7342_v30 }
 0x293   : > { %v1674_v6 = vsub.f32 %v1672_v57, %v1673_v32  ;;  %v1679_v22 = vsub.f32 %v1568_v40, %v1591_v37  ;;  %v1575_v34 = vadd.f32 %v5133_v4, %v1450_v13  ;;  %v5603_v36 = vpack.c.bf16 %v1673_v32, %v1666_v28 }
 0x294   : > { %v2165_v44 = vand.u32 4294901760, %v2164_v46  ;;  %v2089_v13 = vsel %vm2078_vm2, %v2073_v5, 0  ;;  %v2787_v21 = vsub.f32 %v7342_v30, %v2786_v15  ;;  %v2172_v25 = vsub.f32 %v2083_v50, %v7344_v51  ;;  %v3320_v5 = vld [vmem:[#allocation7 + $0x18] sm:$0xff] }
 0x295   : > { %v1680_v59 = vand.u32 4294901760, %v1679_v22  ;;  %v1594_v39 = vand.u32 4294901760, %v1575_v34  ;;  %v1675_v61 = vand.u32 4294901760, %v1674_v6  ;;  %v2191_v26 = vand.u32 4294901760, %v2089_v13 }
 0x296   : > { %v2182_v28 = vsub.f32 %v2086_v60, %v7346_v55  ;;  %v2788_v38 = vand.u32 4294901760, %v2787_v21  ;;  %v3318_v60 = vld [vmem:[#allocation7 + $0x8] sm:$0xff] }
 0x297   : > { %v5582_v45 = vpack.c.bf16 %v1594_v39, %v1591_v37  ;;  %v1686_v56 = vsub.f32 %v1575_v34, %v1594_v39  ;;  %v5585_v10 = vpack.c.bf16 %v1675_v61, %v1668_v14  ;;  %v1681_v24 = vsub.f32 %v1679_v22, %v1680_v59  ;;  %v2695_v14 = vld [vmem:[#allocation16 + $0x8] sm:$0xff]  ;;  %v2696_v61 = vld [vmem:[#allocation16 + $0x10] sm:$0xff] }
 0x298   : > { %v2183_v57 = vand.u32 4294901760, %v2182_v28 }
 0x299   : > { %v1687_v62 = vand.u32 4294901760, %v1686_v56  ;;  %5583 = vmatpush3.bf16.msra.mxu1 %v5582_v45  ;;  %5586 = vmatpush3.bf16.msra.mxu0 %v5585_v10  ;;  %v5594_v53 = vpack.c.bf16 %v1686_v56, %v1679_v22  ;;  %v1682_v48 = vand.u32 4294901760, %v1681_v24  ;;  %v2697_v10 = vld [vmem:[#allocation16 + $0x18] sm:$0xff] }
 0x29a   : > { %5587 = vmatprep.subr.bf16.mxu0 %v6371_v3  ;;  %v2184_v37 = vsub.f32 %v2182_v28, %v2183_v57 }
 0x29b   : > { %v1688_v29 = vsub.f32 %v1686_v56, %v1687_v62  ;;  %v5606_v16 = vpack.c.bf16 %v1687_v62, %v1680_v59  ;;  %v2711_v56 = vsel %vm2078_vm2, %v2696_v61, 0  ;;  %v2714_v62 = vsel %vm2078_vm2, %v2697_v10, 0 }
 0x29c   : > { %5233 = vmatmul.mubr.f32.vlgmr.msra.gmra.mrb[24].mxu1 %v1657_v2  ;;  %v2185_v22 = vand.u32 4294901760, %v2184_v37  ;;  %v2804_v24 = vand.u32 4294901760, %v2711_v56 }
 0x29d   : > { %v1689_v9 = vand.u32 4294901760, %v1688_v29  ;;  %5292 = vmatprep.mubr.f32.mxu1 %v2165_v44  ;;  %v2814_v29 = vand.u32 4294901760, %v2714_v62 }
 0x29f   : > { %v5588_v41 = vpack.c.bf16 %v1689_v9, %v1682_v48  ;;  %v2815_v9 = vsub.f32 %v2714_v62, %v2814_v29 }
 0x2a1   : > { %5589 = vmatpush3.bf16.msra.mxu0 %v5588_v41  ;;  %v2816_v54 = vand.u32 4294901760, %v2815_v9 }
 0x2a2   : > { %5590 = vmatprep.subr.bf16.mxu0 %v6371_v3 }
 0x2a4   : > { %5244 = vmatmul.mubr.f32.vlgmr.msra.gmra.mrb[24].mxu0 %v7302_v33 }
 0x2a5   : > { %5592 = vmatpush3.bf16.msra.mxu0 %v5591_v18  ;;  %5254 = vmatprep.mubr.msk.f32.mxu0 %vm6372_vm0, %v6373_v19 }
 0x2a6   : > { %5593 = vmatprep.subr.bf16.mxu0 %v6371_v3 }
 0x2a9   : > { %5595 = vmatpush3.bf16.msra.mxu0 %v5594_v53 }
 0x2aa   : > { %5596 = vmatprep.subr.bf16.mxu0 %v6371_v3 }
 0x2ac   : > { %5255 = vmatmul.mubr.f32.vlgmr.msra.gmra.mrb[24].mxu0 %v1654_v11 }
 0x2ad   : > { %5598 = vmatpush3.bf16.msra.mxu0 %v5579_v23  ;;  %5265 = vmatprep.mubr.msk.f32.mxu0 %vm6372_vm0, %v6373_v19 }
 0x2ae   : > { %5599 = vmatprep.subr.bf16.mxu0 %v6371_v3 }
 0x2b1   : > { %5601 = vmatpush3.bf16.msra.mxu0 %v5582_v45 }
 0x2b2   : > { %5602 = vmatprep.subr.bf16.mxu0 %v6371_v3 }
 0x2b4   : > { %5266 = vmatmul.mubr.f32.vlgmr.msra.gmra.mrb[24].mxu0 %v1655_v20 }
 0x2b5   : > { %5604 = vmatpush3.bf16.msra.mxu0 %v5603_v36  ;;  %5276 = vmatprep.mubr.msk.f32.mxu0 %vm6372_vm0, %v6373_v19 }
 0x2b6   : > { %5605 = vmatprep.subr.bf16.mxu0 %v6371_v3 }
 0x2b9   : > { %5607 = vmatpush3.bf16.msra.mxu0 %v5606_v16  ;;  %v2805_v16 = vsub.f32 %v2711_v56, %v2804_v24  ;;  %v2077_v56 = vld [vmem:[#allocation14 + $0x18] sm:$0xff] }
 0x2ba   : > { %5608 = vmatprep.subr.bf16.mxu0 %v6371_v3 }
 0x2bb   : > { %v2806_v41 = vand.u32 4294901760, %v2805_v16 }
 0x2bc   : > { %5277 = vmatmul.mubr.f32.vlgmr.msra.gmra.mrb[24].mxu0 %v7302_v33 }
 0x2bd   : > { %5610 = vmatpush3.bf16.msra.mxu0 %v5579_v23  ;;  %5287 = vmatprep.mubr.msk.f32.mxu0 %vm6372_vm0, %v6373_v19  ;;  %v2192_v23 = vsub.f32 %v2089_v13, %v2191_v26  ;;  %v3319_v13 = vld [vmem:[#allocation7 + $0x10] sm:$0xff] }
 0x2be   : > { %5611 = vmatprep.subr.bf16.mxu0 %v6371_v3  ;;  %v3340_v21 = vand.u32 4294901760, %v3319_v13 }
 0x2bf   : > { %v2193_v31 = vand.u32 4294901760, %v2192_v23 }
 0x2c1   : > { %5613 = vmatpush3.bf16.msra.mxu0 %v5582_v45  ;;  %v2194_v6 = vsub.f32 %v2192_v23, %v2193_v31  ;;  %v2708_v45 = vsel %vm2078_vm2, %v2695_v14, 0 }
 0x2c2   : > { %v2794_v2 = vand.u32 4294901760, %v2708_v45 }
 0x2c3   : > { %v2195_v36 = vand.u32 4294901760, %v2194_v6 }
 0x2c4   : > { %5288 = vmatmul.mubr.f32.vlgmr.msra.gmra.mrb[24].mxu0 %v7302_v33  ;;  %v2173_v33 = vand.u32 4294901760, %v2172_v25  ;;  %v2795_v53 = vsub.f32 %v2708_v45, %v2794_v2 }
 0x2c5   : > { %5340 = vmatprep.mubr.f32.mxu0 %v2788_v38 }
 0x2c6   : > { %v2174_v11 = vsub.f32 %v2172_v25, %v2173_v33  ;;  %v2796_v48 = vand.u32 4294901760, %v2795_v53 }
 0x2c8   : > { %v2175_v20 = vand.u32 4294901760, %v2174_v11  ;;  %v2797_v1 = vsub.f32 %v2795_v53, %v2796_v48 }
 0x2ca   : > { %v2798_v44 = vand.u32 4294901760, %v2797_v1  ;;  %v3980_v1 = vld [vmem:[#allocation8] sm:$0xff] }
 0x36f   : > { %v1659_v3 = vpop.f32.mrb[24].mxu1 }
 0x370   : > { %v5234_v58 = vpop.f32.mrb[25].mxu1  ;;  %v1660_v8 = vadd.f32 %v1659_v3, %v1579_v35  ;;  %v2817_v3 = vsub.f32 %v2815_v9, %v2816_v54 }
 0x372   : > { %v2818_v12 = vand.u32 4294901760, %v2817_v3 }
 0x397   : > { %v2065_v40 = vpop.f32.mrb[24].mxu0 }
 0x398   : > { %v5663_v43 = vadd.f32 %v2065_v40, %v1660_v8  ;;  %v5289_v0 = vpop.f32.mrb[25].mxu0 }
 0x39a   : > { %v2069_v32 = vmax.f32 %v5663_v43, 0.0 }
 0x39c   : > { %v2093_v4 = vsel %vm2091_vm3, %v2069_v32, 0  ;;  %2702 = vrot.lane.b32.xlu0 %v2069_v32, %s6374_s29 }
 0x39d   : > { %v2096_v18 = vand.u32 4294901760, %v2093_v4 }
 0x39f   : > { %v2203_v34 = vsub.f32 %v2093_v4, %v2096_v18  ;;  %5290 = vmatprep.subr.mxu1 %v2096_v18 }
 0x3a0   : > { %5291 = vmatpush3.msra.mxu1 %v2096_v18 }
 0x3a1   : > { %5293 = vmatmul.mubr.f32.vlgmr.msra.gmra.mrb[26].mxu1 %v2175_v20  ;;  %v2204_v27 = vand.u32 4294901760, %v2203_v34 }
 0x3a2   : > { %5295 = vmatprep.mubr.f32.mxu1 %v2185_v22 }
 0x3a3   : > { %v2205_v59 = vsub.f32 %v2203_v34, %v2204_v27 }
 0x3a5   : > { %5296 = vmatmul.mubr.f32.gmra.mrb[28].mxu1 %v2195_v36  ;;  %v2206_v39 = vand.u32 4294901760, %v2205_v59  ;;  %v2074_v59 = vld [vmem:[#allocation14] sm:$0xff] }
 0x3a6   : > { %5300 = vmatprep.mubr.f32.mxu1 %v7327_v49 }
 0x3a7   : > { %5298 = vmatprep.subr.mxu1 %v2206_v39 }
 0x3a8   : > { %5299 = vmatpush3.msra.mxu1 %v2206_v39 }
 0x3a9   : > { %5301 = vmatmul.mubr.f32.vlgmr.msra.gmra.mrb[26].mxu1 %v7344_v51  ;;  %5306 = vmatprep.subr.mxu1 %v2203_v34 }
 0x3aa   : > { %5307 = vmatpush3.msra.mxu1 %v2203_v34  ;;  %5303 = vmatprep.mubr.f32.mxu1 %v7346_v55 }
 0x3ab   : > { %5314 = vmatprep.subr.mxu1 %v2096_v18 }
 0x3ad   : > { %5304 = vmatmul.mubr.f32.gmra.mrb[28].mxu1 %v2191_v26 }
 0x3ae   : > { %5308 = vmatprep.mubr.f32.mxu1 %v7330_v47 }
 0x3b1   : > { %5309 = vmatmul.mubr.f32.vlgmr.msra.gmra.mrb[26].mxu1 %v2172_v25 }
 0x3b2   : > { %5315 = vmatpush3.msra.mxu1 %v2096_v18  ;;  %5311 = vmatprep.mubr.f32.mxu1 %v2182_v28  ;;  %v7385_v28 = vsub.f32 %v3319_v13, %v3340_v21 }
 0x3b3   : > { %5322 = vmatprep.subr.mxu1 %v2204_v27 }
 0x3b5   : > { %5312 = vmatmul.mubr.f32.gmra.mrb[28].mxu1 %v2192_v23 }
 0x3b6   : > { %5316 = vmatprep.mubr.f32.mxu1 %v2163_v52 }
 0x3b9   : > { %5317 = vmatmul.mubr.f32.vlgmr.msra.gmra.mrb[26].mxu1 %v2173_v33 }
 0x3ba   : > { %5323 = vmatpush3.msra.mxu1 %v2204_v27  ;;  %5319 = vmatprep.mubr.f32.mxu1 %v2183_v57  ;;  %v3467_v57 = vand.u32 4294901760, %v7385_v28  ;;  %v2075_v27 = vld [vmem:[#allocation14 + $0x8] sm:$0xff] }
 0x3bb   : > { %5330 = vmatprep.subr.mxu1 %v2096_v18 }
 0x3bc   : > { %v3468_v11 = vsub.f32 %v7385_v28, %v3467_v57 }
 0x3bd   : > { %5320 = vmatmul.mubr.f32.gmra.mrb[28].mxu1 %v2193_v31 }
 0x3be   : > { %5324 = vmatprep.mubr.f32.mxu1 %v7327_v49  ;;  %v3469_v4 = vand.u32 4294901760, %v3468_v11 }
 0x3c1   : > { %5325 = vmatmul.mubr.f32.vlgmr.msra.gmra.mrb[26].mxu1 %v7344_v51 }
 0x3c2   : > { %5331 = vmatpush3.msra.mxu1 %v2096_v18  ;;  %5327 = vmatprep.mubr.f32.mxu1 %v7346_v55 }
 0x3c5   : > { %5328 = vmatmul.mubr.f32.gmra.mrb[28].mxu1 %v2191_v26 }
 0x3c6   : > { %5332 = vmatprep.mubr.f32.mxu1 %v7327_v49  ;;  %v2807_v49 = vsub.f32 %v2805_v16, %v2806_v41 }
 0x3c8   : > { %v2808_v58 = vand.u32 4294901760, %v2807_v49 }
 0x3c9   : > { %5333 = vmatmul.mubr.f32.vlgmr.msra.gmra.mrb[26].mxu1 %v7344_v51  ;;  %v3317_v51 = vld [vmem:[#allocation7] sm:$0xff] }
 0x3ca   : > { %5335 = vmatprep.mubr.f32.mxu1 %v7346_v55  ;;  %v3338_v55 = vand.u32 4294901760, %v3320_v5 }
 0x3cc   : > { %v7392_v38 = vsub.f32 %v3320_v5, %v3338_v55 }
 0x3cd   : > { %5336 = vmatmul.mubr.f32.gmra.mrb[28].mxu1 %v2191_v26 }
 0x3ce   : > { %3402 = vmatprep.mubr.f32.mxu1 %v6373_v19  ;;  %v3461_v33 = vand.u32 4294901760, %v7392_v38 }
 0x3d0   : > { %v3462_v43 = vsub.f32 %v7392_v38, %v3461_v33 }
 0x3d2   : > { %v3463_v32 = vand.u32 4294901760, %v3462_v43 }
 0x40e   : > { %v2703_v47 = vpop.permute.xlu0 %2702 }
 0x40f   : > { %v2716_v52 = vsel %vm2091_vm3, %v2703_v47, 0  ;;  %v3998_v47 = vand.u32 4294901760, %v3980_v1 }
 0x410   : > { %v2719_v46 = vand.u32 4294901760, %v2716_v52 }
 0x412   : > { %v2826_v63 = vsub.f32 %v2716_v52, %v2719_v46  ;;  %5338 = vmatprep.subr.mxu0 %v2719_v46 }
 0x413   : > { %5339 = vmatpush3.msra.mxu0 %v2719_v46 }
 0x414   : > { %5341 = vmatmul.mubr.f32.vlgmr.msra.gmra.mrb[26].mxu0 %v2798_v44  ;;  %v2827_v17 = vand.u32 4294901760, %v2826_v63 }
 0x415   : > { %5343 = vmatprep.mubr.f32.mxu0 %v2808_v58 }
 0x416   : > { %v2828_v42 = vsub.f32 %v2826_v63, %v2827_v17 }
 0x418   : > { %5344 = vmatmul.mubr.f32.gmra.mrb[28].mxu0 %v2818_v12  ;;  %v2829_v50 = vand.u32 4294901760, %v2828_v42 }
 0x419   : > { %5348 = vmatprep.mubr.f32.mxu0 %v7338_v7 }
 0x41a   : > { %5346 = vmatprep.subr.mxu0 %v2829_v50 }
 0x41b   : > { %5347 = vmatpush3.msra.mxu0 %v2829_v50 }
 0x41c   : > { %5349 = vmatmul.mubr.f32.vlgmr.msra.gmra.mrb[26].mxu0 %v2794_v2  ;;  %5354 = vmatprep.subr.mxu0 %v2826_v63 }
 0x41d   : > { %5355 = vmatpush3.msra.mxu0 %v2826_v63  ;;  %5351 = vmatprep.mubr.f32.mxu0 %v2804_v24  ;;  %v7416_v63 = vsub.f32 %v3980_v1, %v3998_v47 }
 0x41e   : > { %5362 = vmatprep.subr.mxu0 %v2719_v46 }
 0x41f   : > { %v4117_v50 = vand.u32 4294901760, %v7416_v63 }
 0x420   : > { %5352 = vmatmul.mubr.f32.gmra.mrb[28].mxu0 %v2814_v29 }
 0x421   : > { %5356 = vmatprep.mubr.f32.mxu0 %v7342_v30  ;;  %v3334_v30 = vand.u32 4294901760, %v3318_v60 }
 0x423   : > { %v7379_v35 = vpack.c.bf16 %v3338_v55, %v3334_v30 }
 0x424   : > { %5357 = vmatmul.mubr.f32.vlgmr.msra.gmra.mrb[26].mxu0 %v2795_v53  ;;  %v3981_v53 = vld [vmem:[#allocation8 + $0x8] sm:$0xff] }
 0x425   : > { %5363 = vmatpush3.msra.mxu0 %v2719_v46  ;;  %5359 = vmatprep.mubr.f32.mxu0 %v2805_v16 }
 0x426   : > { %5370 = vmatprep.subr.mxu0 %v2827_v17  ;;  %5615 = vmatprep.subr.bf16.mxu1 %v7379_v35 }
 0x428   : > { %5360 = vmatmul.mubr.f32.gmra.mrb[28].mxu0 %v2815_v9  ;;  %v3996_v9 = vand.u32 4294901760, %v3981_v53 }
 0x429   : > { %5364 = vmatprep.mubr.f32.mxu0 %v2786_v15  ;;  %v3336_v15 = vand.u32 4294901760, %v3317_v51 }
 0x42a   : > { %v7412_v44 = vsub.f32 %v3981_v53, %v3996_v9 }
 0x42b   : > { %v7381_v25 = vsub.f32 %v3317_v51, %v3336_v15  ;;  %v7383_v26 = vpack.c.bf16 %v3340_v21, %v3336_v15 }
 0x42c   : > { %5365 = vmatmul.mubr.f32.vlgmr.msra.gmra.mrb[26].mxu0 %v2796_v48 }
 0x42d   : > { %5371 = vmatpush3.msra.mxu0 %v2827_v17  ;;  %5367 = vmatprep.mubr.f32.mxu0 %v2806_v41  ;;  %v3455_v23 = vand.u32 4294901760, %v7381_v25  ;;  %v5624_v22 = vpack.c.bf16 %v7385_v28, %v7381_v25  ;;  %v4111_v17 = vand.u32 4294901760, %v7412_v44 }
 0x42e   : > { %5378 = vmatprep.subr.mxu0 %v2719_v46  ;;  %5617 = vmatpush1.bf16.msra.mxu1 %v7383_v26 }
 0x42f   : > { %v3456_v0 = vsub.f32 %v7381_v25, %v3455_v23  ;;  %v7410_v36 = vpack.c.bf16 %v3467_v57, %v3455_v23  ;;  %v4112_v5 = vsub.f32 %v7412_v44, %v4111_v17  ;;  %v2698_v25 = vld [vmem:[#allocation17] sm:$0xff] }
 0x430   : > { %5368 = vmatmul.mubr.f32.gmra.mrb[28].mxu0 %v2816_v54  ;;  %v3982_v54 = vld [vmem:[#allocation8 + $0x10] sm:$0xff] }
 0x431   : > { %5372 = vmatprep.mubr.f32.mxu0 %v7338_v7  ;;  %v3457_v37 = vand.u32 4294901760, %v3456_v0  ;;  %v4002_v52 = vand.u32 4294901760, %v3982_v54  ;;  %v4113_v13 = vand.u32 4294901760, %v4112_v5 }
 0x433   : > { %v7402_v20 = vpack.c.bf16 %v3469_v4, %v3457_v37  ;;  %v7418_v12 = vsub.f32 %v3982_v54, %v4002_v52 }
 0x434   : > { %5373 = vmatmul.mubr.f32.vlgmr.msra.gmra.mrb[26].mxu0 %v2794_v2 }
 0x435   : > { %5379 = vmatpush3.msra.mxu0 %v2719_v46  ;;  %5375 = vmatprep.mubr.f32.mxu0 %v2804_v24 }
 0x438   : > { %5376 = vmatmul.mubr.f32.gmra.mrb[28].mxu0 %v2814_v29 }
 0x439   : > { %5380 = vmatprep.mubr.f32.mxu0 %v7338_v7  ;;  %v7390_v7 = vsub.f32 %v3318_v60, %v3334_v30  ;;  %v4129_v60 = vand.u32 4294901760, %v7418_v12  ;;  %v4118_v30 = vsub.f32 %v7416_v63, %v4117_v50 }
 0x43b   : > { %v3449_v8 = vand.u32 4294901760, %v7390_v7  ;;  %v5622_v6 = vpack.c.bf16 %v7392_v38, %v7390_v7  ;;  %v4130_v55 = vsub.f32 %v7418_v12, %v4129_v60  ;;  %v4119_v21 = vand.u32 4294901760, %v4118_v30 }
 0x43c   : > { %5381 = vmatmul.mubr.f32.vlgmr.msra.gmra.mrb[26].mxu0 %v2794_v2  ;;  %v2076_v2 = vld [vmem:[#allocation14 + $0x10] sm:$0xff] }
 0x43d   : > { %5383 = vmatprep.mubr.f32.mxu0 %v2804_v24  ;;  %v3450_v40 = vsub.f32 %v7390_v7, %v3449_v8  ;;  %v7408_v34 = vpack.c.bf16 %v3461_v33, %v3449_v8  ;;  %v4131_v8 = vand.u32 4294901760, %v4130_v55  ;;  %v7479_v7 = vpack.c.bf16 %v4129_v60, %v4117_v50 }
 0x43f   : > { %v3451_v31 = vand.u32 4294901760, %v3450_v40  ;;  %v5644_v43 = vpack.c.bf16 %v4131_v8, %v4119_v21 }
 0x440   : > { %5384 = vmatmul.mubr.f32.gmra.mrb[28].mxu0 %v2814_v29  ;;  %v3983_v29 = vld [vmem:[#allocation8 + $0x18] sm:$0xff] }
 0x441   : > { %4193 = vmatprep.mubr.f32.mxu0 %v6373_v19  ;;  %v5618_v18 = vpack.c.bf16 %v3463_v32, %v3451_v31  ;;  %v4000_v41 = vand.u32 4294901760, %v3983_v29 }
 0x443   : > { %5619 = vmatprep.subr.bf16.mxu1 %v5618_v18  ;;  %v7414_v3 = vsub.f32 %v3983_v29, %v4000_v41  ;;  %v7436_v4 = vpack.c.bf16 %v4000_v41, %v3996_v9  ;;  %v7438_v18 = vpack.c.bf16 %v4002_v52, %v3998_v47 }
 0x445   : > { %v4123_v42 = vand.u32 4294901760, %v7414_v3 }
 0x447   : > { %v4124_v51 = vsub.f32 %v7414_v3, %v4123_v42 }
 0x449   : > { %v4125_v15 = vand.u32 4294901760, %v4124_v51 }
 0x44b   : > { %v5642_v23 = vpack.c.bf16 %v4125_v15, %v4113_v13 }
 0x44d   : > { %5643 = vmatprep.subr.bf16.mxu0 %v5642_v23 }
 0x44e   : > { %5645 = vmatpush1.bf16.msra.mxu0 %v5644_v43 }
 0x49c   : > { %v5334_v39 = vpop.f32.mrb[26].mxu1 }
 0x49d   : > { %v5664_v14 = vadd.f32 %v5334_v39, %v2075_v27  ;;  %v2648_v61 = vpop.f32.mrb[27].mxu1  ;;  %v5646_v27 = vpack.c.bf16 %v7414_v3, %v7412_v44 }
 0x49e   : > { %v5665_v45 = vadd.f32 %v2648_v61, %v2074_v59  ;;  %v5648_v59 = vpack.c.bf16 %v7418_v12, %v7416_v63 }
 0x49f   : > { %v4853_v10 = vmul.f32 -1.442695, %v5664_v14  ;;  %5647 = vmatprep.subr.bf16.mxu0 %v5646_v27 }
 0x4a0   : > { %v4852_v24 = vmul.f32 -1.442695, %v5665_v45  ;;  %v5337_v62 = vpop.f32.mrb[28].mxu1 }
 0x4a1   : > { %5947 = vpow2.f32 %v4853_v10  ;;  %v5666_v16 = vadd.f32 %v5337_v62, %v2077_v56  ;;  %v2660_v48 = vpop.f32.mrb[29].mxu1 }
 0x4a2   : > { %5949 = vpow2.f32 %v4852_v24  ;;  %v5667_v49 = vadd.f32 %v2660_v48, %v2076_v2 }
 0x4a3   : > { %v4855_v46 = vmul.f32 -1.442695, %v5666_v16 }
 0x4a4   : > { %v4854_v58 = vmul.f32 -1.442695, %v5667_v49 }
 0x4a5   : > { %5951 = vpow2.f32 %v4855_v46 }
 0x4a6   : > { %5953 = vpow2.f32 %v4854_v58 }
 0x4ab   : > { %v5948_v33 = vpop.eup %5947 }
 0x4ac   : > { %v5950_v57 = vpop.eup %5949  ;;  %v2683_v40 = vadd.f32 1.0, %v5948_v33 }
 0x4ad   : > { %v2682_v0 = vadd.f32 1.0, %v5950_v57 }
 0x4ae   : > { %5955 = vrcp.f32 %v2683_v40 }
 0x4af   : > { %v5952_v11 = vpop.eup %5951  ;;  %5957 = vrcp.f32 %v2682_v0 }
 0x4b0   : > { %v5954_v31 = vpop.eup %5953  ;;  %v2685_v32 = vadd.f32 1.0, %v5952_v11 }
 0x4b1   : > { %v2684_v37 = vadd.f32 1.0, %v5954_v31 }
 0x4b2   : > { %5959 = vrcp.f32 %v2685_v32 }
 0x4b3   : > { %5961 = vrcp.f32 %v2684_v37 }
 0x4b8   : > { %v5956_v39 = vpop.eup %5955 }
 0x4b9   : > { %v5958_v14 = vpop.eup %5957  ;;  %v3326_v61 = vsel %vm3321_vm4, %v5956_v39, 0 }
 0x4ba   : > { %v3323_v45 = vsel %vm3321_vm4, %v5958_v14, 0  ;;  %v7446_v56 = vand.u32 4294901760, %v3326_v61 }
 0x4bb   : > { %v7448_v10 = vand.u32 4294901760, %v3323_v45 }
 0x4bc   : > { %v5960_v2 = vpop.eup %5959  ;;  %v3415_v24 = vsub.f32 %v3326_v61, %v7446_v56 }
 0x4bd   : > { %v5962_v62 = vpop.eup %5961  ;;  %v3404_v53 = vsub.f32 %v3323_v45, %v7448_v10  ;;  %v3332_v29 = vsel %vm3321_vm4, %v5960_v2, 0 }
 0x4be   : > { %v3416_v16 = vand.u32 4294901760, %v3415_v24  ;;  %v3329_v48 = vsel %vm3321_vm4, %v5962_v62, 0  ;;  %v7454_v9 = vand.u32 4294901760, %v3332_v29 }
 0x4bf   : > { %v3405_v41 = vand.u32 4294901760, %v3404_v53  ;;  %v7456_v1 = vand.u32 4294901760, %v3329_v48 }
 0x4c0   : > { %v3417_v49 = vsub.f32 %v3415_v24, %v3416_v16  ;;  %v3437_v52 = vsub.f32 %v3332_v29, %v7454_v9 }
 0x4c1   : > { %v3406_v54 = vsub.f32 %v3404_v53, %v3405_v41  ;;  %v3426_v47 = vsub.f32 %v3329_v48, %v7456_v1 }
 0x4c2   : > { %v3418_v5 = vand.u32 4294901760, %v3417_v49  ;;  %v3438_v30 = vand.u32 4294901760, %v3437_v52 }
 0x4c3   : > { %v3407_v46 = vand.u32 4294901760, %v3406_v54  ;;  %v3427_v58 = vand.u32 4294901760, %v3426_v47 }
 0x4c4   : > { %v3439_v13 = vsub.f32 %v3437_v52, %v3438_v30 }
 0x4c5   : > { %3408 = vmatmul.mubr.f32.vlgmr.msra.gmra.mrb[30].mxu1 %v3407_v46  ;;  %v3428_v51 = vsub.f32 %v3426_v47, %v3427_v58 }
 0x4c6   : > { %3413 = vmatprep.mubr.f32.mxu1 %v6373_v19  ;;  %5621 = vmatpush1.bf16.msra.mxu1 %v7402_v20  ;;  %v3440_v15 = vand.u32 4294901760, %v3439_v13  ;;  %v7472_v20 = vpack.c.bf16 %v4123_v42, %v4111_v17 }
 0x4c7   : > { %5623 = vmatprep.subr.bf16.mxu1 %v5622_v6  ;;  %v3429_v55 = vand.u32 4294901760, %v3428_v51 }
 0x4c9   : > { %3419 = vmatmul.mubr.f32.gmra.mrb[32].mxu1 %v3418_v5 }
 0x4ca   : > { %3424 = vmatprep.mubr.f32.mxu1 %v6373_v19 }
 0x4cd   : > { %3430 = vmatmul.mubr.f32.gmra.mrb[34].mxu1 %v3429_v55 }
 0x4ce   : > { %3435 = vmatprep.mubr.f32.mxu1 %v6373_v19 }
 0x4d1   : > { %3441 = vmatmul.mubr.f32.gmra.mrb[36].mxu1 %v3440_v15 }
 0x4d2   : > { %3531 = vmatprep.mubr.f32.mxu1 %v6373_v19 }
 0x4d5   : > { %3533 = vmatmul.mubr.f32.vlgmr.msra.gmra.mrb[30].mxu1 %v7448_v10 }
 0x4d6   : > { %3538 = vmatprep.mubr.f32.mxu1 %v6373_v19  ;;  %5625 = vmatpush1.bf16.msra.mxu1 %v5624_v22 }
 0x4d7   : > { %5627 = vmatprep.subr.bf16.mxu1 %v7379_v35 }
 0x4d9   : > { %3540 = vmatmul.mubr.f32.gmra.mrb[32].mxu1 %v7446_v56 }
 0x4da   : > { %3545 = vmatprep.mubr.f32.mxu1 %v6373_v19 }
 0x4dd   : > { %3547 = vmatmul.mubr.f32.gmra.mrb[34].mxu1 %v7456_v1 }
 0x4de   : > { %3552 = vmatprep.mubr.f32.mxu1 %v6373_v19 }
 0x4e1   : > { %3554 = vmatmul.mubr.f32.gmra.mrb[36].mxu1 %v7454_v9 }
 0x4e2   : > { %3632 = vmatprep.mubr.f32.mxu1 %v6373_v19 }
 0x4e5   : > { %3635 = vmatmul.mubr.f32.vlgmr.msra.gmra.mrb[30].mxu1 %v3404_v53 }
 0x4e6   : > { %3640 = vmatprep.mubr.f32.mxu1 %v6373_v19  ;;  %5629 = vmatpush1.bf16.msra.mxu1 %v7383_v26 }
 0x4e7   : > { %5631 = vmatprep.subr.bf16.mxu1 %v7408_v34  ;;  %v2701_v34 = vld [vmem:[#allocation17 + $0x18] sm:$0xff] }
 0x4e9   : > { %3643 = vmatmul.mubr.f32.gmra.mrb[32].mxu1 %v3415_v24 }
 0x4ea   : > { %3648 = vmatprep.mubr.f32.mxu1 %v6373_v19 }
 0x4ed   : > { %3651 = vmatmul.mubr.f32.gmra.mrb[34].mxu1 %v3426_v47 }
 0x4ee   : > { %3656 = vmatprep.mubr.f32.mxu1 %v6373_v19 }
 0x4f1   : > { %3659 = vmatmul.mubr.f32.gmra.mrb[36].mxu1 %v3437_v52 }
 0x4f2   : > { %3733 = vmatprep.mubr.f32.mxu1 %v6373_v19 }
 0x4f5   : > { %3737 = vmatmul.mubr.f32.vlgmr.msra.gmra.mrb[30].mxu1 %v3405_v41 }
 0x4f6   : > { %3742 = vmatprep.mubr.f32.mxu1 %v6373_v19  ;;  %5633 = vmatpush1.bf16.msra.mxu1 %v7410_v36  ;;  %v2700_v36 = vld [vmem:[#allocation17 + $0x10] sm:$0xff] }
 0x4f7   : > { %5635 = vmatprep.subr.bf16.mxu1 %v7379_v35  ;;  %v2699_v35 = vld [vmem:[#allocation17 + $0x8] sm:$0xff] }
 0x4f9   : > { %3746 = vmatmul.mubr.f32.gmra.mrb[32].mxu1 %v3416_v16 }
 0x4fa   : > { %3751 = vmatprep.mubr.f32.mxu1 %v6373_v19 }
 0x4fd   : > { %3755 = vmatmul.mubr.f32.gmra.mrb[34].mxu1 %v3427_v58 }
 0x4fe   : > { %3760 = vmatprep.mubr.f32.mxu1 %v6373_v19 }
 0x501   : > { %3764 = vmatmul.mubr.f32.gmra.mrb[36].mxu1 %v3438_v30 }
 0x502   : > { %3846 = vmatprep.mubr.f32.mxu1 %v6373_v19 }
 0x505   : > { %3848 = vmatmul.mubr.f32.vlgmr.msra.gmra.mrb[30].mxu1 %v7448_v10 }
 0x506   : > { %3853 = vmatprep.mubr.f32.mxu1 %v6373_v19  ;;  %5637 = vmatpush1.bf16.msra.mxu1 %v7383_v26 }
 0x507   : > { %5639 = vmatprep.subr.bf16.mxu1 %v7436_v4 }
 0x509   : > { %3855 = vmatmul.mubr.f32.gmra.mrb[32].mxu1 %v7446_v56 }
 0x50a   : > { %3860 = vmatprep.mubr.f32.mxu1 %v6373_v19 }
 0x50d   : > { %3862 = vmatmul.mubr.f32.gmra.mrb[34].mxu1 %v7456_v1 }
 0x50e   : > { %3867 = vmatprep.mubr.f32.mxu1 %v6373_v19 }
 0x50f   : > { %v5382_v28 = vpop.f32.mrb[26].mxu0 }
 0x510   : > { %v5668_v38 = vadd.f32 %v5382_v28, %v2699_v35  ;;  %v3271_v6 = vpop.f32.mrb[27].mxu0 }
 0x511   : > { %v5669_v22 = vadd.f32 %v3271_v6, %v2698_v25  ;;  %3869 = vmatmul.mubr.f32.gmra.mrb[36].mxu1 %v7454_v9 }
 0x512   : > { %v4857_v26 = vmul.f32 -1.442695, %v5668_v38  ;;  %3943 = vmatprep.mubr.f32.mxu1 %v6373_v19 }
 0x513   : > { %v4856_v44 = vmul.f32 -1.442695, %v5669_v22  ;;  %v5385_v3 = vpop.f32.mrb[28].mxu0  ;;  %v5979_v22 = vld [vmem:[%s6762_s18] sm:$0xff] }
 0x514   : > { %5963 = vpow2.f32 %v4857_v26  ;;  %v5670_v17 = vadd.f32 %v5385_v3, %v2701_v34  ;;  %v3283_v42 = vpop.f32.mrb[29].mxu0 }
 0x515   : > { %5965 = vpow2.f32 %v4856_v44  ;;  %v5671_v50 = vadd.f32 %v3283_v42, %v2700_v36  ;;  %3945 = vmatmul.mubr.f32.vlgmr.msra.gmra.mrb[30].mxu1 %v7448_v10  ;;  %v5980_v44 = vld [vmem:[%s6762_s18 + $0x8] sm:$0xff] }
 0x516   : > { %v4859_v60 = vmul.f32 -1.442695, %v5670_v17  ;;  %3950 = vmatprep.mubr.f32.mxu1 %v6373_v19  ;;  %5641 = vmatpush1.bf16.msra.mxu1 %v7438_v18 }
 0x517   : > { %v4858_v21 = vmul.f32 -1.442695, %v5671_v50 }
 0x518   : > { %5967 = vpow2.f32 %v4859_v60 }
 0x519   : > { %5969 = vpow2.f32 %v4858_v21  ;;  %3952 = vmatmul.mubr.f32.gmra.mrb[32].mxu1 %v7446_v56  ;;  %v5981_v21 = vld [vmem:[%s6762_s18 + $0x10] sm:$0xff] }
 0x51a   : > { %3957 = vmatprep.mubr.f32.mxu1 %v6373_v19 }
 0x51d   : > { %3959 = vmatmul.mubr.f32.gmra.mrb[34].mxu1 %v7456_v1 }
 0x51e   : > { %v5964_v8 = vpop.eup %5963  ;;  %3964 = vmatprep.mubr.f32.mxu1 %v6373_v19 }
 0x51f   : > { %v5966_v33 = vpop.eup %5965  ;;  %v3306_v23 = vadd.f32 1.0, %v5964_v8 }
 0x520   : > { %v3305_v57 = vadd.f32 1.0, %v5966_v33 }
 0x521   : > { %5971 = vrcp.f32 %v3306_v23  ;;  %3966 = vmatmul.mubr.f32.gmra.mrb[36].mxu1 %v7454_v9 }
 0x522   : > { %v5968_v40 = vpop.eup %5967  ;;  %5973 = vrcp.f32 %v3305_v57  ;;  %4064 = vmatprep.mubr.f32.mxu1 %v6373_v19  ;;  %v5982_v57 = vld [vmem:[%s6762_s18 + $0x18] sm:$0xff] }
 0x523   : > { %v5970_v43 = vpop.eup %5969  ;;  %v3308_v0 = vadd.f32 1.0, %v5968_v40 }
 0x524   : > { %v3307_v11 = vadd.f32 1.0, %v5970_v43 }
 0x525   : > { %5975 = vrcp.f32 %v3308_v0 }
 0x526   : > { %5977 = vrcp.f32 %v3307_v11 }
 0x52b   : > { %v5972_v31 = vpop.eup %5971 }
 0x52c   : > { %v5974_v32 = vpop.eup %5973  ;;  %v3988_v37 = vsel %vm3321_vm4, %v5972_v31, 0 }
 0x52d   : > { %v3985_v27 = vsel %vm3321_vm4, %v5974_v32, 0  ;;  %v7525_v39 = vand.u32 4294901760, %v3988_v37  ;;  %v5983_v32 = vld [vmem:[%s6762_s18 + $0x20] sm:$0xff] }
 0x52e   : > { %v7527_v14 = vand.u32 4294901760, %v3985_v27 }
 0x52f   : > { %v5976_v61 = vpop.eup %5975  ;;  %v4077_v45 = vsub.f32 %v3988_v37, %v7525_v39 }
 0x530   : > { %v5978_v56 = vpop.eup %5977  ;;  %v4066_v10 = vsub.f32 %v3985_v27, %v7527_v14  ;;  %4195 = vmatmul.mubr.f32.vlgmr.msra.gmra.mrb[30].mxu0 %v7527_v14  ;;  %v3994_v2 = vsel %vm3321_vm4, %v5976_v61, 0 }
 0x531   : > { %4200 = vmatprep.mubr.f32.mxu0 %v6373_v19  ;;  %5649 = vmatpush1.bf16.msra.mxu0 %v5648_v59  ;;  %v3991_v24 = vsel %vm3321_vm4, %v5978_v56, 0  ;;  %v4078_v29 = vand.u32 4294901760, %v4077_v45  ;;  %v4098_v16 = vand.u32 4294901760, %v3994_v2 }
 0x532   : > { %v4067_v62 = vand.u32 4294901760, %v4066_v10  ;;  %v4087_v53 = vand.u32 4294901760, %v3991_v24  ;;  %5651 = vmatprep.subr.bf16.mxu0 %v7436_v4 }
 0x533   : > { %v4079_v1 = vsub.f32 %v4077_v45, %v4078_v29  ;;  %v4099_v49 = vsub.f32 %v3994_v2, %v4098_v16 }
 0x534   : > { %4202 = vmatmul.mubr.f32.gmra.mrb[32].mxu0 %v7525_v39  ;;  %v4068_v48 = vsub.f32 %v4066_v10, %v4067_v62  ;;  %v4088_v9 = vsub.f32 %v3991_v24, %v4087_v53  ;;  %v5985_v24 = vld [vmem:[%s6762_s18 + $0x30] sm:$0xff] }
 0x535   : > { %4207 = vmatprep.mubr.f32.mxu0 %v6373_v19  ;;  %v4080_v63 = vand.u32 4294901760, %v4079_v1  ;;  %v4100_v59 = vand.u32 4294901760, %v4099_v49 }
 0x536   : > { %v4069_v41 = vand.u32 4294901760, %v4068_v48  ;;  %v4089_v54 = vand.u32 4294901760, %v4088_v9 }
 0x537   : > { %v4101_v52 = vsub.f32 %v4099_v49, %v4100_v59 }
 0x538   : > { %4070 = vmatmul.mubr.f32.vlgmr.msra.gmra.mrb[38].mxu1 %v4069_v41  ;;  %4209 = vmatmul.mubr.f32.gmra.mrb[34].mxu0 %v4087_v53  ;;  %v4090_v12 = vsub.f32 %v4088_v9, %v4089_v54 }
 0x539   : > { %4075 = vmatprep.mubr.f32.mxu1 %v6373_v19  ;;  %4214 = vmatprep.mubr.f32.mxu0 %v6373_v19  ;;  %v4102_v46 = vand.u32 4294901760, %v4101_v52 }
 0x53a   : > { %v4091_v47 = vand.u32 4294901760, %v4090_v12 }
 0x53c   : > { %4081 = vmatmul.mubr.f32.gmra.mrb[40].mxu1 %v4080_v63  ;;  %4216 = vmatmul.mubr.f32.gmra.mrb[36].mxu0 %v4098_v16 }
 0x53d   : > { %4086 = vmatprep.mubr.f32.mxu1 %v6373_v19  ;;  %4294 = vmatprep.mubr.f32.mxu0 %v6373_v19 }
 0x540   : > { %4092 = vmatmul.mubr.f32.gmra.mrb[42].mxu1 %v4091_v47  ;;  %4297 = vmatmul.mubr.f32.vlgmr.msra.gmra.mrb[30].mxu0 %v4066_v10 }
 0x541   : > { %4097 = vmatprep.mubr.f32.mxu1 %v6373_v19  ;;  %4302 = vmatprep.mubr.f32.mxu0 %v6373_v19 }
 0x542   : > { %5653 = vmatpush1.bf16.msra.mxu0 %v7438_v18 }
 0x543   : > { %5655 = vmatprep.subr.bf16.mxu0 %v7472_v20 }
 0x544   : > { %4103 = vmatmul.mubr.f32.gmra.mrb[44].mxu1 %v4102_v46  ;;  %4305 = vmatmul.mubr.f32.gmra.mrb[32].mxu0 %v4077_v45 }
 0x545   : > { %4310 = vmatprep.mubr.f32.mxu0 %v6373_v19 }
 0x548   : > { %4313 = vmatmul.mubr.f32.gmra.mrb[34].mxu0 %v4088_v9 }
 0x549   : > { %4318 = vmatprep.mubr.f32.mxu0 %v6373_v19 }
 0x54c   : > { %4321 = vmatmul.mubr.f32.gmra.mrb[36].mxu0 %v4099_v49 }
 0x54d   : > { %4395 = vmatprep.mubr.f32.mxu0 %v6373_v19 }
 0x550   : > { %4399 = vmatmul.mubr.f32.vlgmr.msra.gmra.mrb[30].mxu0 %v4067_v62 }
 0x551   : > { %4404 = vmatprep.mubr.f32.mxu0 %v6373_v19  ;;  %5657 = vmatpush1.bf16.msra.mxu0 %v7479_v7 }
 0x552   : > { %5659 = vmatprep.subr.bf16.mxu0 %v7436_v4 }
 0x554   : > { %4408 = vmatmul.mubr.f32.gmra.mrb[32].mxu0 %v4078_v29 }
 0x555   : > { %4413 = vmatprep.mubr.f32.mxu0 %v6373_v19 }
 0x558   : > { %4417 = vmatmul.mubr.f32.gmra.mrb[34].mxu0 %v4089_v54 }
 0x559   : > { %4422 = vmatprep.mubr.f32.mxu0 %v6373_v19 }
 0x55c   : > { %4426 = vmatmul.mubr.f32.gmra.mrb[36].mxu0 %v4100_v59 }
 0x55d   : > { %4508 = vmatprep.mubr.f32.mxu0 %v6373_v19 }
 0x560   : > { %4510 = vmatmul.mubr.f32.vlgmr.msra.gmra.mrb[30].mxu0 %v7527_v14 }
 0x561   : > { %4515 = vmatprep.mubr.f32.mxu0 %v6373_v19  ;;  %5661 = vmatpush1.bf16.msra.mxu0 %v7438_v18 }
 0x564   : > { %4517 = vmatmul.mubr.f32.gmra.mrb[32].mxu0 %v7525_v39 }
 0x565   : > { %4522 = vmatprep.mubr.f32.mxu0 %v6373_v19 }
 0x568   : > { %4524 = vmatmul.mubr.f32.gmra.mrb[34].mxu0 %v4087_v53 }
 0x569   : > { %4529 = vmatprep.mubr.f32.mxu0 %v6373_v19 }
 0x56c   : > { %4531 = vmatmul.mubr.f32.gmra.mrb[36].mxu0 %v4098_v16 }
 0x56d   : > { %4605 = vmatprep.mubr.f32.mxu0 %v6373_v19 }
 0x570   : > { %4607 = vmatmul.mubr.f32.vlgmr.msra.gmra.mrb[30].mxu0 %v7527_v14  ;;  %v5984_v14 = vld [vmem:[%s6762_s18 + $0x28] sm:$0xff] }
 0x571   : > { %4612 = vmatprep.mubr.f32.mxu0 %v6373_v19 }
 0x574   : > { %4614 = vmatmul.mubr.f32.gmra.mrb[32].mxu0 %v7525_v39 }
 0x575   : > { %4619 = vmatprep.mubr.f32.mxu0 %v6373_v19 }
 0x578   : > { %4621 = vmatmul.mubr.f32.gmra.mrb[34].mxu0 %v4087_v53 }
 0x579   : > { %4626 = vmatprep.mubr.f32.mxu0 %v6373_v19 }
 0x57c   : > { %4628 = vmatmul.mubr.f32.gmra.mrb[36].mxu0 %v4098_v16  ;;  %v5986_v16 = vld [vmem:[%s6762_s18 + $0x38] sm:$0xff] }
 0x5e8   : > { %v3946_v4 = vpop.f32.mrb[30].mxu1 }
 0x5e9   : > { %v3948_v18 = vpop.f32.mrb[31].mxu1  ;;  %v3972_v34 = vmul.f32 %v5979_v22, %v3946_v4 }
 0x5ea   : > { %v3973_v3 = vmul.f32 %v5980_v44, %v3948_v18 }
 0x5ec   : > { %v3953_v58 = vpop.f32.mrb[32].mxu1 }
 0x5ed   : > { %v3955_v5 = vpop.f32.mrb[33].mxu1  ;;  %v3974_v8 = vmul.f32 %v5981_v21, %v3953_v58 }
 0x5ee   : > { %v3975_v40 = vmul.f32 %v5982_v57, %v3955_v5 }
 0x5f0   : > { %v3960_v51 = vpop.f32.mrb[34].mxu1 }
 0x5f1   : > { %v3962_v30 = vpop.f32.mrb[35].mxu1  ;;  %v3976_v37 = vmul.f32 %v5983_v32, %v3960_v51 }
 0x5f2   : > { %v3977_v61 = vmul.f32 %v5984_v14, %v3962_v30 }
 0x5f4   : > { %v3967_v55 = vpop.f32.mrb[36].mxu1 }
 0x5f5   : > { %v3969_v13 = vpop.f32.mrb[37].mxu1  ;;  %v3978_v62 = vmul.f32 %v5985_v24, %v3967_v55 }
 0x5f6   : > { %v3979_v48 = vmul.f32 %v5986_v16, %v3969_v13 }
 0x60b   : > { %v4071_v15 = vpop.f32.mrb[38].mxu1 }
 0x60c   : > { %v4073_v20 = vpop.f32.mrb[39].mxu1 }
 0x60f   : > { %v4082_v7 = vpop.f32.mrb[40].mxu1 }
 0x610   : > { %v4084_v35 = vpop.f32.mrb[41].mxu1 }
 0x613   : > { %v4093_v25 = vpop.f32.mrb[42].mxu1 }
 0x614   : > { %v4095_v28 = vpop.f32.mrb[43].mxu1 }
 0x617   : > { %v4104_v19 = vpop.f32.mrb[44].mxu1 }
 0x618   : > { %v4106_v38 = vpop.f32.mrb[45].mxu1 }
 0x643   : > { %v4608_v6 = vpop.f32.mrb[30].mxu0 }
 0x644   : > { %v5672_v26 = vadd.f32 %v4608_v6, %v4071_v15  ;;  %v4610_v36 = vpop.f32.mrb[31].mxu0 }
 0x645   : > { %v5673_v17 = vadd.f32 %v4610_v36, %v4073_v20 }
 0x646   : > { %v4634_v42 = vmul.f32 %v5672_v26, %v3972_v34 }
 0x647   : > { %v4635_v50 = vmul.f32 %v5673_v17, %v3973_v3  ;;  %v4615_v60 = vpop.f32.mrb[32].mxu0 }
 0x648   : > { %4642 = vst [vmem:[%s7575_s10] sm:$0xff] %v4634_v42  ;;  %v5674_v33 = vadd.f32 %v4615_v60, %v4082_v7  ;;  %v4617_v23 = vpop.f32.mrb[33].mxu0 }
 0x649   : > { %4643 = vst [vmem:[%s7575_s10 + $0x8] sm:$0xff] %v4635_v50  ;;  %v5675_v43 = vadd.f32 %v4617_v23, %v4084_v35 }
 0x64a   : > { %v4636_v0 = vmul.f32 %v5674_v33, %v3974_v8 }
 0x64b   : > { %v4637_v11 = vmul.f32 %v5675_v43, %v3975_v40  ;;  %v4622_v31 = vpop.f32.mrb[34].mxu0 }
 0x64c   : > { %4644 = vst [vmem:[%s7575_s10 + $0x10] sm:$0xff] %v4636_v0  ;;  %v5676_v27 = vadd.f32 %v4622_v31, %v4093_v25  ;;  %v4624_v39 = vpop.f32.mrb[35].mxu0 }
 0x64d   : > { %4645 = vst [vmem:[%s7575_s10 + $0x18] sm:$0xff] %v4637_v11  ;;  %v5677_v45 = vadd.f32 %v4624_v39, %v4095_v28 }
 0x64e   : > { %v4638_v56 = vmul.f32 %v5676_v27, %v3976_v37 }
 0x64f   : > { %v4639_v10 = vmul.f32 %v5677_v45, %v3977_v61  ;;  %v4629_v2 = vpop.f32.mrb[36].mxu0 }
 0x650   : > { %4646 = vst [vmem:[%s7575_s10 + $0x20] sm:$0xff] %v4638_v56  ;;  %v5678_v53 = vadd.f32 %v4629_v2, %v4104_v19  ;;  %v4631_v29 = vpop.f32.mrb[37].mxu0 }
 0x651   : > { %4647 = vst [vmem:[%s7575_s10 + $0x28] sm:$0xff] %v4639_v10  ;;  %v5679_v9 = vadd.f32 %v4631_v29, %v4106_v38 }
 0x652   : > { %v4640_v41 = vmul.f32 %v5678_v53, %v3978_v62 }
 0x653   : > { %v4641_v1 = vmul.f32 %v5679_v9, %v3979_v48 }
 0x654   : > { %4648 = vst [vmem:[%s7575_s10 + $0x30] sm:$0xff] %v4640_v41 }
 0x655   : > { %4649 = vst [vmem:[%s7575_s10 + $0x38] sm:$0xff] %v4641_v1 }
 0x656   : > { %6282 = shalt.err (!%p6279_p3)
}
 0x657   : > { %s6283_s25 = scalar_lea.hbm %s7595_s17, 1024  ;;  %s6287_s10 = scalar_lea.hbm %s7842_s19, 2048 }
 0x658   : > { %p6284_p0 = scmp.ne.s32.totalorder %s7595_s17, %s6283_s25  ;;  %p6288_p7 = scmp.lt.u32.totalorder %s7595_s17, %s7842_s19 }
 0x659   : > { %p6289_p10 = scmp.lt.u32.totalorder %s6287_s10, %s6283_s25  ;;  %p6291_p11 = scmp.lt.u32.totalorder %s6283_s25, %s7595_s17 }
 0x65a   : > { %p6285_p5 = pnand %p6284_p0, %p7843_p12 }
 0x65b   : > { %p6290_p1 = por %p6289_p10, %p6288_p7 }
 0x65c   : > { %p6286_p2 = pneg %p6285_p5 }
 0x65d   : > { %p6292_p13 = por %p6291_p11, %p6290_p1 }
 0x65f   : > { %p6293_p8 = pnand %p6292_p13, %p6286_p2 }
 0x661   : > { %6296 = shalt.err (!%p6293_p8)
}
 0x662   : > { %s6376_s21 = smov 256   ;;  %s6377_s1 = smov 16  }
 0x663   : > { %5838 = dma.vmem_to_hbm [thread:$0]  (%p7843_p12), %s7589_s24, 1024, %s7595_s17, %s4651_s12, %s6376_s21, %s6376_s21, %s6377_s1  }
 0x664 PF: > { %s4680_s22 = sand.u32 1, %s6343_s13   ;;  %p7844_p6 = scmp.ne.s32.totalorder %s7754_s30, 0 }
 0x665   : > { %p7845_p9 = scmp.ge.s32.totalorder %s6355_s16, 2  ;;  %s4681_s2 = scalar_lea.sflag [#allocation4], %s4680_s22 }
 0x667   : > { %p5873_p4 = pnand %p7845_p9, %p7844_p6 }
 0x669   : > { %6338 = dma.done.wait (!%p5873_p4), %s4681_s2, 1024  }
 0x66a   : > { %6340 = vsyncadd (!%p5873_p4), %s4681_s2, 4294966272  ;;  %p28_p3 = scmp.ge.s32.totalorder %s6680_s11, 4   ;;  %s7846_s13 = smov %s6347_s14 }
 0x66b   : > { %s7847_s14 = smov %s6351_s15  ;;  %s7848_s15 = smov %s6692_s26 }
 0x66c   : > { %s7849_s16 = smov %s6680_s11  ;;  %30 = sbr.rel (!%p28_p3) target bundleno = 15 (0xf), region = 141 }
 0x673   :  { %4686 = vsyncpa [#allocation3], 1 }
 0x674   :  { %4688 = vsyncpa [#allocation3 + $0x1], 1 }
 0x675   :  { %4689 = vsyncpa [#allocation6], 1 }
 0x676   :  { %4690 = vsyncpa [#allocation9], 1 }
 0x677   :  { %4691 = vsyncpa [#allocation12], 1 }
 0x678   :  { %4692 = vsyncpa [#allocation15], 1 }
 0x679   :  { %4693 = vsyncpa [#allocation18], 1 }
 0x67a   :  { %4694 = vsyncpa [#allocation4], 1 }
 0x67b   :  { %4696 = vsyncpa [#allocation4 + $0x1], 1 }

</bundles_post_ra>
